<compile_context>
chip_gen: v5e
topology: v5e:2x2
jax: 0.10.0
libtpu: 0.0.40
codegen_flags: <defaults>
</compile_context>

<pallas_src>
import functools
import math

import jax
import jax.numpy as jnp
from jax.experimental import pallas as pl
from jax.experimental.pallas import tpu as pltpu


def _round_up(a, b):
    return (a + b - 1) // b * b


def _tpu_defaults():
    """Generation-dependent tiling / VMEM knobs."""
    kind = ""
    try:
        kind = jax.devices()[0].device_kind.lower()
    except Exception:
        pass
    if "v7" in kind:                       # 64 MiB physical VMEM, 256-deep MXU
        return {"big_mxu": True, "vmem_cap": 48 << 20}
    if "v6" in kind:                       # 128 MiB physical VMEM, 256-deep MXU
        return {"big_mxu": True, "vmem_cap": 100 << 20}
    if any(v in kind for v in ("v5", "v4", "v3", "v2")):   # 128-deep MXU
        return {"big_mxu": False, "vmem_cap": 100 << 20}
    return {"big_mxu": False, "vmem_cap": 48 << 20}        # unknown: conservative


def _conv2d_kernel(x_ref, w_ref, b_ref, o_ref, *acc_refs,
                   tap_offs, grp, Pt, Qe, cw, pi_axis, kc_axis, nkc):
    """Implicit-GEMM conv tile.

    x_ref: (1, Hs, Ws, CD)   space-to-depth padded input slab (full spatial extent,
                             one image, one channel chunk)
    w_ref: (R*S, cw, tn)     weights, w_ref[t][c, k] = weight[k, c, r(t), s(t)]
    b_ref: (1, tn)           fp32 bias row (zero-padded out channels)
    o_ref: (1, Pt, Qe, tn)   output row-tile (lane-dense last dim, Qe % 8 == 0)
    acc_refs: optional (Pt*Qe, tn) fp32 accumulator (only when nkc > 1)
    """
    tn = o_ref.shape[-1]
    row0 = pl.program_id(pi_axis) * Pt

    contrib = None
    # Static loop over tap *groups*: each group is one deep MXU contraction
    # (depth g*cw) instead of g shallow ones.
    for t0, g in grp:
        parts = []
        for t in range(t0, t0 + g):
            ro, co, ch0 = tap_offs[t]
            parts.append(x_ref[0, pl.ds(row0 + ro, Pt), co:co + Qe, ch0:ch0 + cw])
        a = parts[0] if g == 1 else jnp.concatenate(parts, axis=-1)   # (Pt, Qe, g*cw)
        a = a.reshape(Pt * Qe, g * cw)                                # layout-free: Qe%8==0
        w = w_ref[t0] if g == 1 else w_ref[t0:t0 + g].reshape(g * cw, tn)
        d = jnp.dot(a, w, preferred_element_type=jnp.float32)
        contrib = d if contrib is None else contrib + d

    if nkc == 1:
        out = contrib + b_ref[...]                                    # fp32 bias add, once
        o_ref[0] = out.reshape(Pt, Qe, tn).astype(o_ref.dtype)
    else:
        acc_ref = acc_refs[0]
        kc = pl.program_id(kc_axis)

        @pl.when(kc == 0)
        def _():
            acc_ref[...] = contrib

        @pl.when(kc != 0)
        def _():
            acc_ref[...] = acc_ref[...] + contrib

        @pl.when(kc == nkc - 1)
        def _():
            out = acc_ref[...] + b_ref[...]
            o_ref[0] = out.reshape(Pt, Qe, tn).astype(o_ref.dtype)


def _prep_weight_bias(weight, bias, Cp, Kpad):
    """(K,C,R,S) -> (R*S, Cp, Kpad) weight slab and fp32 (1, Kpad) bias row."""
    K, C, R, S = weight.shape
    w_g = jnp.transpose(weight, (2, 3, 1, 0)).reshape(R * S, C, K)
    w_g = jnp.pad(w_g, ((0, 0), (0, Cp - C), (0, Kpad - K)))
    if bias is None:
        b_row = jnp.zeros((1, Kpad), dtype=jnp.float32)
    else:
        b_row = jnp.pad(bias.astype(jnp.float32).reshape(1, K),
                        ((0, 0), (0, Kpad - K)))
    return w_g, b_row


def _conv2d_forward_core(x, w_g, b_row, K, R, S, stride, padding, dilation,
                         compute_dtype=None):
    N, C, H, W = x.shape
    RS, Cp, Kpad = w_g.shape
    assert RS == R * S and Cp >= C and Cp % 8 == 0
    sh, sw = stride
    ph, pw = padding
    dh, dw = dilation
    P = (H + 2 * ph - dh * (R - 1) - 1) // sh + 1
    Q = (W + 2 * pw - dw * (S - 1) - 1) // sw + 1
    assert P > 0 and Q > 0, "empty conv output"

    out_dtype = x.dtype
    out_item = jnp.dtype(out_dtype).itemsize
    in_dtype = out_dtype if compute_dtype is None else jnp.dtype(compute_dtype)
    in_item = jnp.dtype(in_dtype).itemsize

    hw = _tpu_defaults()
    tn = 256 if (hw["big_mxu"] and Kpad % 256 == 0) else 128
    nj = Kpad // tn

    F = sh * sw
    # Channel-chunk (reduction) grid axis only when BlockSpec chunking is clean
    # (stride 1) and C is big enough that the weight block needs bounding.
    chunk = (F == 1 and Cp % 128 == 0 and Cp > 256)
    if chunk:
        tc = 256 if Cp % 256 == 0 else 128
        nkc = Cp // tc
        cd_block = tc
    else:
        tc = Cp
        nkc = 1
        cd_block = F * Cp
    cw = tc                              # per-tap contraction width inside the kernel

    # Fold taps into groups so each MXU contraction has depth ~256.
    G = max(1, min(RS, 256 // max(cw, 1)))
    grp = tuple((t0, min(G, RS - t0)) for t0 in range(0, RS, G))
    max_g = max(g for _, g in grp)

    Qe = _round_up(Q, 8)                 # layout-free (P,Qe,*) <-> (P*Qe,*) reshapes
    halo_h = ((R - 1) * dh) // sh
    halo_w = ((S - 1) * dw) // sw
    Ws = Qe + halo_w

    # ---- output-row tile Pt: fit acc + out + folded-A tile within the VMEM budget.
    vmem_cap = hw["vmem_cap"]
    lane_cd = _round_up(max(cd_block, 128), 128)
    fixed = (2 * (P + halo_h) * _round_up(Ws, 8) * lane_cd * in_item   # x slab (dbl buf)
             + 2 * RS * tc * tn * in_item                              # w block (dbl buf)
             + 2 * 8 * 128 * 4)                                        # bias
    per_row = Qe * (tn * (2 * out_item + (4 if nkc > 1 else 0) + 4)
                    + _round_up(max(max_g * cw, 128), 128) * in_item)
    budget = max(int(0.55 * vmem_cap) - fixed, per_row)
    Pt = max(1, min(P, budget // per_row))
    # v7x megacore: make sure there are >= 2 parallel blocks for the 2 TensorCores.
    if N * nj < 2 and P > 1:
        Pt = min(Pt, (P + 1) // 2)
    nPt = -(-P // Pt)
    Pt = -(-P // nPt)
    Ppad = nPt * Pt

    Hs = Ppad + halo_h
    target_h, target_w = Hs * sh, Ws * sw

    # ---- glue (single cheap passes): NCHW -> NHWC, channel pad to Cp, spatial
    # zero-pad/crop to exactly the window the kernel reads, then stride-phase
    # space-to-depth so every in-kernel tap slice is unit-stride.
    x_nhwc = jnp.transpose(x, (0, 2, 3, 1))
    if compute_dtype is not None:
        x_nhwc = x_nhwc.astype(in_dtype)
        w_g = w_g.astype(in_dtype)
    keep_h = min(H, max(0, target_h - ph))
    keep_w = min(W, max(0, target_w - pw))
    x_nhwc = x_nhwc[:, :keep_h, :keep_w, :]
    x_pad = jnp.pad(x_nhwc, ((0, 0),
                             (ph, target_h - ph - keep_h),
                             (pw, target_w - pw - keep_w),
                             (0, Cp - C)))
    if F == 1:
        x_in = x_pad                                             # (N, Hs, Ws, Cp)
    else:
        x_in = x_pad.reshape(N, Hs, sh, Ws, sw, Cp)
        x_in = x_in.transpose(0, 1, 3, 2, 4, 5).reshape(N, Hs, Ws, F * Cp)

    # Static per-tap offsets in the space-to-depth layout.
    tap_offs = []
    for r in range(R):
        for s in range(S):
            ro = (r * dh) // sh
            co = (s * dw) // sw
            ch0 = 0 if chunk else (((r * dh) % sh) * sw + ((s * dw) % sw)) * Cp
            tap_offs.append((ro, co, ch0))
    tap_offs = tuple(tap_offs)

    # ---- grid order by operand residency.
    x_img_bytes = Hs * Ws * cd_block * nkc * in_item
    w_bytes = RS * Cp * Kpad * in_item
    weight_outer = (nkc == 1) and ((nj - 1) * N * x_img_bytes
                                   < (N * nPt - 1) * w_bytes)
    if weight_outer:
        grid = (nj, N, nPt, nkc)
        pi_axis = 2
        x_map = lambda j, n, pi, kc: (n, 0, 0, kc)
        w_map = lambda j, n, pi, kc: (0, kc, j)
        b_map = lambda j, n, pi, kc: (0, j)
        o_map = lambda j, n, pi, kc: (n, pi, 0, j)
    else:
        grid = (N, nPt, nj, nkc)
        pi_axis = 1
        x_map = lambda n, pi, j, kc: (n, 0, 0, kc)
        w_map = lambda n, pi, j, kc: (0, kc, j)
        b_map = lambda n, pi, j, kc: (0, j)
        o_map = lambda n, pi, j, kc: (n, pi, 0, j)
    kc_axis = 3

    scratch = [pltpu.VMEM((Pt * Qe, tn), jnp.float32)] if nkc > 1 else []

    a_tmp = Pt * Qe * (_round_up(max(max_g * cw, 128), 128) * in_item + tn * 4)
    est = (2 * Hs * _round_up(Ws, 8) * lane_cd * in_item
           + 2 * RS * tc * tn * in_item
           + 2 * Pt * Qe * tn * out_item
           + (Pt * Qe * tn * 4 if nkc > 1 else 0)
           + a_tmp + (2 * 8 * 128 * 4))
    vmem_limit = int(min(max(int(est * 1.25) + (4 << 20), 32 << 20), vmem_cap))

    flops = 2 * N * Ppad * Qe * RS * Cp * Kpad
    bytes_accessed = int(x_in.size * in_item + w_g.size * in_item
                         + N * Ppad * Qe * Kpad * out_item)

    kernel = functools.partial(
        _conv2d_kernel, tap_offs=tap_offs, grp=grp, Pt=Pt, Qe=Qe, cw=cw,
        pi_axis=pi_axis, kc_axis=kc_axis, nkc=nkc)

    out = pl.pallas_call(
        kernel,
        out_shape=jax.ShapeDtypeStruct((N, Ppad, Qe, Kpad), out_dtype),
        grid_spec=pltpu.PrefetchScalarGridSpec(
            num_scalar_prefetch=0,
            grid=grid,
            in_specs=[
                pl.BlockSpec((1, Hs, Ws, cd_block), x_map),
                pl.BlockSpec((RS, tc, tn), w_map),
                pl.BlockSpec((1, tn), b_map),
            ],
            out_specs=pl.BlockSpec((1, Pt, Qe, tn), o_map),
            scratch_shapes=scratch),
        compiler_params=pltpu.CompilerParams(
            dimension_semantics=("parallel", "parallel", "parallel", "arbitrary"),
            vmem_limit_bytes=vmem_limit),
        cost_estimate=pl.CostEstimate(flops=int(flops), transcendentals=0,
                                      bytes_accessed=bytes_accessed),
    )(x_in, w_g, b_row)

    # glue: drop spatial / out-channel padding, NHWC -> NCHW (module contract is NKPQ).
    return jnp.transpose(out[:, :P, :Q, :K], (0, 3, 1, 2))


def conv2d_forward_pallas(x, weight, bias, stride=(1, 1), padding=(0, 0),
                          dilation=(1, 1), compute_dtype=None):
    """Conv2d forward. x: (N,C,H,W), weight: (K,C,R,S), bias: (K,) or None.
    Returns (N,K,P,Q) — same semantics as the Triton conv2d_forward."""
    K, C, R, S = weight.shape
    Cp = _round_up(C, 8)
    Kpad = _round_up(K, 128)
    w_g, b_row = _prep_weight_bias(weight, bias, Cp, Kpad)
    return _conv2d_forward_core(x, w_g, b_row, K, R, S, stride, padding,
                                dilation, compute_dtype)


class Conv2dPallas:
    """JAX/Pallas counterpart of Conv2d_triton (forward only, groups=1, zero padding)."""

    def __init__(self, in_channels, out_channels, kernel_size, stride=1,
                 padding=0, dilation=1, bias=True, *, key, dtype=jnp.float32,
                 compute_dtype=None):
        if isinstance(kernel_size, int):
            kernel_size = (kernel_size, kernel_size)
        if isinstance(stride, int):
            stride = (stride, stride)
        if isinstance(padding, int):
            padding = (padding, padding)
        if isinstance(dilation, int):
            dilation = (dilation, dilation)
        self.stride, self.padding, self.dilation = stride, padding, dilation
        self.in_channels, self.out_channels = in_channels, out_channels
        self.kernel_size = kernel_size
        self.compute_dtype = compute_dtype

        kh, kw = kernel_size
        fan_in = in_channels * kh * kw
        # kaiming_uniform_(a=sqrt(5)) => bound = 1/sqrt(fan_in); bias uses same bound.
        bound = 1.0 / math.sqrt(fan_in)
        k_w, k_b = jax.random.split(key)
        self.weight = jax.random.uniform(
            k_w, (out_channels, in_channels, kh, kw), dtype, -bound, bound)
        self.bias = (jax.random.uniform(k_b, (out_channels,), dtype, -bound, bound)
                     if bias else None)

        # Weight/bias are re-laid-out and padded once here (not per forward call).
        Cp = _round_up(in_channels, 8)
        Kpad = _round_up(out_channels, 128)
        self._w_prepped, self._b_row = _prep_weight_bias(self.weight, self.bias,
                                                         Cp, Kpad)

    def __call__(self, x):
        return _conv2d_forward_core(
            x, self._w_prepped, self._b_row, self.out_channels,
            self.kernel_size[0], self.kernel_size[1],
            self.stride, self.padding, self.dilation, self.compute_dtype)


if __name__ == "__main__":
    key = jax.random.PRNGKey(0)

    def check(name, N, C, H, W, K, R, S, stride, padding, dilation, k):
        k_x, k_mod = jax.random.split(k)
        x = jax.random.normal(k_x, (N, C, H, W), dtype=jnp.float32)
        conv = Conv2dPallas(C, K, (R, S), stride=stride, padding=padding,
                            dilation=dilation, bias=True, key=k_mod)
        out = jax.block_until_ready(conv(x))
        ref = jax.lax.conv_general_dilated(
            x, conv.weight, window_strides=stride,
            padding=[(padding[0], padding[0]), (padding[1], padding[1])],
            rhs_dilation=dilation,
            dimension_numbers=("NCHW", "OIHW", "NCHW"),
            precision=jax.lax.Precision.HIGHEST,
        ) + conv.bias[None, :, None, None]
        assert out.shape == ref.shape, (name, out.shape, ref.shape)
        err = float(jnp.max(jnp.abs(out - ref)))
        assert jnp.allclose(out, ref, atol=1e-3, rtol=1e-3), (name, err)

    k1, k2 = jax.random.split(key)
    # stride-1 3x3 conv with padding (the basic case)
    check("s1", 2, 4, 16, 16, 8, 3, 3, (1, 1), (1, 1), (1, 1), k1)
    # stride-2 with odd sizes / unaligned C, K: exercises the stride-phase
    # space-to-depth path and the Q / out-channel padding.
    check("s2", 2, 6, 13, 13, 10, 3, 3, (2, 2), (1, 1), (1, 1), k2)

    print("KERNEL_OK")
</pallas_src>

<mosaic_0001>
module attributes {stable_mosaic.version = 11 : i64} {
  func.func @_conv2d_kernel(%arg0: i32, %arg1: i32, %arg2: i32, %arg3: i32, %arg4: memref<1x18x18x8xf32, #tpu.memory_space<vmem>>, %arg5: memref<9x8x128xf32, #tpu.memory_space<vmem>>, %arg6: memref<1x128xf32, #tpu.memory_space<vmem>>, %arg7: memref<1x16x16x128xf32, #tpu.memory_space<vmem>>) attributes {dimension_semantics = [#tpu.dimension_semantics<parallel>, #tpu.dimension_semantics<parallel>, #tpu.dimension_semantics<parallel>, #tpu.dimension_semantics<arbitrary>], iteration_bounds = array<i64: 1, 2, 1, 1>, scalar_prefetch = 0 : i64, scratch_operands = 0 : i64, tpu.core_type = #tpu.core_type<tc>, window_params = [{transform_indices = @transform_0, window_bounds = array<i64: 1, 18, 18, 8>}, {transform_indices = @transform_1, window_bounds = array<i64: 9, 8, 128>}, {transform_indices = @transform_2, window_bounds = array<i64: 1, 128>}, {transform_indices = @transform_3, window_bounds = array<i64: 1, 16, 16, 128>}]} {
    %c16_i32 = arith.constant 16 : i32
    %0 = arith.muli %arg2, %c16_i32 : i32
    %c0_i32 = arith.constant 0 : i32
    %1 = arith.addi %0, %c0_i32 : i32
    %c0 = arith.constant 0 : index
    %2 = arith.index_cast %1 : i32 to index
    %c0_0 = arith.constant 0 : index
    %c0_1 = arith.constant 0 : index
    %3 = vector.load %arg4[%c0, %2, %c0_0, %c0_1] : memref<1x18x18x8xf32, #tpu.memory_space<vmem>>, vector<1x16x16x8xf32>
    %4 = vector.shape_cast %3 : vector<1x16x16x8xf32> to vector<16x16x8xf32>
    %c0_i32_2 = arith.constant 0 : i32
    %5 = arith.addi %0, %c0_i32_2 : i32
    %c0_3 = arith.constant 0 : index
    %6 = arith.index_cast %5 : i32 to index
    %c1 = arith.constant 1 : index
    %c0_4 = arith.constant 0 : index
    %7 = vector.load %arg4[%c0_3, %6, %c1, %c0_4] : memref<1x18x18x8xf32, #tpu.memory_space<vmem>>, vector<1x16x16x8xf32>
    %8 = vector.shape_cast %7 : vector<1x16x16x8xf32> to vector<16x16x8xf32>
    %c0_i32_5 = arith.constant 0 : i32
    %9 = arith.addi %0, %c0_i32_5 : i32
    %c0_6 = arith.constant 0 : index
    %10 = arith.index_cast %9 : i32 to index
    %c2 = arith.constant 2 : index
    %c0_7 = arith.constant 0 : index
    %11 = vector.load %arg4[%c0_6, %10, %c2, %c0_7] : memref<1x18x18x8xf32, #tpu.memory_space<vmem>>, vector<1x16x16x8xf32>
    %12 = vector.shape_cast %11 : vector<1x16x16x8xf32> to vector<16x16x8xf32>
    %c1_i32 = arith.constant 1 : i32
    %13 = arith.addi %0, %c1_i32 : i32
    %c0_8 = arith.constant 0 : index
    %14 = arith.index_cast %13 : i32 to index
    %c0_9 = arith.constant 0 : index
    %c0_10 = arith.constant 0 : index
    %15 = vector.load %arg4[%c0_8, %14, %c0_9, %c0_10] : memref<1x18x18x8xf32, #tpu.memory_space<vmem>>, vector<1x16x16x8xf32>
    %16 = vector.shape_cast %15 : vector<1x16x16x8xf32> to vector<16x16x8xf32>
    %c1_i32_11 = arith.constant 1 : i32
    %17 = arith.addi %0, %c1_i32_11 : i32
    %c0_12 = arith.constant 0 : index
    %18 = arith.index_cast %17 : i32 to index
    %c1_13 = arith.constant 1 : index
    %c0_14 = arith.constant 0 : index
    %19 = vector.load %arg4[%c0_12, %18, %c1_13, %c0_14] : memref<1x18x18x8xf32, #tpu.memory_space<vmem>>, vector<1x16x16x8xf32>
    %20 = vector.shape_cast %19 : vector<1x16x16x8xf32> to vector<16x16x8xf32>
    %c1_i32_15 = arith.constant 1 : i32
    %21 = arith.addi %0, %c1_i32_15 : i32
    %c0_16 = arith.constant 0 : index
    %22 = arith.index_cast %21 : i32 to index
    %c2_17 = arith.constant 2 : index
    %c0_18 = arith.constant 0 : index
    %23 = vector.load %arg4[%c0_16, %22, %c2_17, %c0_18] : memref<1x18x18x8xf32, #tpu.memory_space<vmem>>, vector<1x16x16x8xf32>
    %24 = vector.shape_cast %23 : vector<1x16x16x8xf32> to vector<16x16x8xf32>
    %c2_i32 = arith.constant 2 : i32
    %25 = arith.addi %0, %c2_i32 : i32
    %c0_19 = arith.constant 0 : index
    %26 = arith.index_cast %25 : i32 to index
    %c0_20 = arith.constant 0 : index
    %c0_21 = arith.constant 0 : index
    %27 = vector.load %arg4[%c0_19, %26, %c0_20, %c0_21] : memref<1x18x18x8xf32, #tpu.memory_space<vmem>>, vector<1x16x16x8xf32>
    %28 = vector.shape_cast %27 : vector<1x16x16x8xf32> to vector<16x16x8xf32>
    %c2_i32_22 = arith.constant 2 : i32
    %29 = arith.addi %0, %c2_i32_22 : i32
    %c0_23 = arith.constant 0 : index
    %30 = arith.index_cast %29 : i32 to index
    %c1_24 = arith.constant 1 : index
    %c0_25 = arith.constant 0 : index
    %31 = vector.load %arg4[%c0_23, %30, %c1_24, %c0_25] : memref<1x18x18x8xf32, #tpu.memory_space<vmem>>, vector<1x16x16x8xf32>
    %32 = vector.shape_cast %31 : vector<1x16x16x8xf32> to vector<16x16x8xf32>
    %c2_i32_26 = arith.constant 2 : i32
    %33 = arith.addi %0, %c2_i32_26 : i32
    %c0_27 = arith.constant 0 : index
    %34 = arith.index_cast %33 : i32 to index
    %c2_28 = arith.constant 2 : index
    %c0_29 = arith.constant 0 : index
    %35 = vector.load %arg4[%c0_27, %34, %c2_28, %c0_29] : memref<1x18x18x8xf32, #tpu.memory_space<vmem>>, vector<1x16x16x8xf32>
    %36 = vector.shape_cast %35 : vector<1x16x16x8xf32> to vector<16x16x8xf32>
    %37 = tpu.concatenate %4, %8, %12, %16, %20, %24, %28, %32, %36 in 2 : vector<16x16x8xf32>, vector<16x16x8xf32>, vector<16x16x8xf32>, vector<16x16x8xf32>, vector<16x16x8xf32>, vector<16x16x8xf32>, vector<16x16x8xf32>, vector<16x16x8xf32>, vector<16x16x8xf32> -> vector<16x16x72xf32>
    %38 = vector.shape_cast %37 : vector<16x16x72xf32> to vector<256x72xf32>
    %c0_30 = arith.constant 0 : index
    %c0_31 = arith.constant 0 : index
    %c0_32 = arith.constant 0 : index
    %39 = vector.load %arg5[%c0_30, %c0_31, %c0_32] : memref<9x8x128xf32, #tpu.memory_space<vmem>>, vector<9x8x128xf32>
    %40 = vector.shape_cast %39 : vector<9x8x128xf32> to vector<72x128xf32>
    %cst = arith.constant dense<0.000000e+00> : vector<256x128xf32>
    %41 = tpu.matmul %38, %40, %cst {dimension_numbers = #tpu.dot_dimension_numbers<[1], [0], [0], [1], [0, 0, 1, 1], [], []>} : vector<256x72xf32>, vector<72x128xf32>, vector<256x128xf32> -> vector<256x128xf32>
    %c0_33 = arith.constant 0 : index
    %c0_34 = arith.constant 0 : index
    %42 = vector.load %arg6[%c0_33, %c0_34] : memref<1x128xf32, #tpu.memory_space<vmem>>, vector<1x128xf32>
    %43 = vector.broadcast %42 : vector<1x128xf32> to vector<256x128xf32>
    %44 = arith.addf %41, %43 : vector<256x128xf32>
    %45 = vector.shape_cast %44 : vector<256x128xf32> to vector<16x16x128xf32>
    %c0_35 = arith.constant 0 : index
    %c0_36 = arith.constant 0 : index
    %c0_37 = arith.constant 0 : index
    %c0_38 = arith.constant 0 : index
    %46 = vector.load %arg7[%c0_35, %c0_36, %c0_37, %c0_38] : memref<1x16x16x128xf32, #tpu.memory_space<vmem>>, vector<1x16x16x128xf32>
    %47 = vector.shape_cast %46 : vector<1x16x16x128xf32> to vector<16x16x128xf32>
    %48 = vector.shape_cast %45 : vector<16x16x128xf32> to vector<1x16x16x128xf32>
    tpu.vector_store %arg7[%c0_35, %c0_36, %c0_37, %c0_38], %48 {strides = array<i32>} : memref<1x16x16x128xf32, #tpu.memory_space<vmem>>, vector<1x16x16x128xf32>,
    return
  }
  func.func @transform_0(%arg0: i32, %arg1: i32, %arg2: i32, %arg3: i32) -> (i32, i32, i32, i32) {
    %c0_i32 = arith.constant 0 : i32
    %c0_i32_0 = arith.constant 0 : i32
    %c0_i32_1 = arith.constant 0 : i32
    return %arg1, %c0_i32, %c0_i32_0, %arg3 : i32, i32, i32, i32
  }
  func.func @transform_1(%arg0: i32, %arg1: i32, %arg2: i32, %arg3: i32) -> (i32, i32, i32) {
    %c0_i32 = arith.constant 0 : i32
    %c0_i32_0 = arith.constant 0 : i32
    return %c0_i32, %arg3, %arg0 : i32, i32, i32
  }
  func.func @transform_2(%arg0: i32, %arg1: i32, %arg2: i32, %arg3: i32) -> (i32, i32) {
    %c0_i32 = arith.constant 0 : i32
    %c0_i32_0 = arith.constant 0 : i32
    return %c0_i32, %arg0 : i32, i32
  }
  func.func @transform_3(%arg0: i32, %arg1: i32, %arg2: i32, %arg3: i32) -> (i32, i32, i32, i32) {
    %c0_i32 = arith.constant 0 : i32
    %c0_i32_0 = arith.constant 0 : i32
    return %arg1, %arg2, %c0_i32, %arg0 : i32, i32, i32, i32
  }
}

</mosaic_0001>

<bundles_post_ra>
// kernel: tpu_custom_call.1
= control target key start
LH: loop header
LB: loop body
LE: loop exit
PB: predicated region body
PF: predicated region fallthrough
CT: control target
= control target key end

     0   :  { %8 = vsyncpa [#allocation3], 0  ;;  %s4531_s0 = inlined_call_operand.vmem [shape: f32[2,18,18,8], index: 0, kind: input, shape index: {}]   ;;  %s4532_s1 = inlined_call_operand.vmem [shape: f32[9,8,128], index: 1, kind: input, shape index: {}]   ;;  %s4533_s2 = inlined_call_operand.vmem [shape: f32[1,128], index: 2, kind: input, shape index: {}]   ;;  %s4534_s3 = inlined_call_operand.hbm [shape: f32[2,16,16,128], index: 3, kind: output, shape index: {}]  }
   0x1   :  { %10 = vsyncpa [#allocation3 + $0x1], 0  ;;  %s2686_s12 = smov 0   ;;  %s2688_s13 = smov 0  }
   0x2   :  { %s2690_s14 = smov 0   ;;  %s2692_s15 = smov 0  }
   0x3   :  { %s2694_s16 = smov 0   ;;  %s2696_s17 = smov 0  }
   0x4 LB: > { %s2239_s18 = sadd.s32 4294967295, %s2655_s17   ;;  %s2240_s19 = sadd.s32 4294967294, %s2655_s17   ;;  %s2655_s17 = sphi %s2696_s17, %s16_s17   ;;  %s2651_s16 = sphi %s2694_s16, %s4820_s16   ;;  %s2647_s15 = sphi %s2692_s15, %s4819_s15   ;;  %s2643_s14 = sphi %s2690_s14, %s4818_s14   ;;  %s2639_s13 = sphi %s2688_s13, %s4817_s13   ;;  %s2635_s12 = sphi %s2686_s12, %s4816_s12  }
   0x5   : > { %s38_s20 = sadd.s32 1, %s2651_s16  ;;  %s135_s21 = sadd.s32 1, %s2643_s14 }
   0x6   : > { %p40_p0 = scmp.ge.s32.totalorder %s38_s20, 2  ;;  %p145_p1 = scmp.ne.s32.totalorder %s2643_s14, %s2639_s13 }
   0x7   : > { %p146_p2 = scmp.eq.s32.totalorder %s2239_s18, 1  ;;  %p151_p3 = scmp.ne.s32.totalorder %s2639_s13, %s2635_s12 }
   0x8   : > { %s4822_s20 = smov (%p40_p0, %s38_s20), 0  ;;  %p152_p5 = scmp.eq.s32.totalorder %s2240_s19, 1 }
   0x9   : > { %p2726_p4 = por %p146_p2, %p145_p1  ;;  %s128_s23 = ssub.s32 %s2651_s16, %s4822_s20 }
   0xa   : > { %p2245_p6 = scmp.ge.s32.totalorder %s2655_s17, 1  ;;  %p133_p7 = scmp.eq.s32.totalorder %s128_s23, 0 }
   0xb   : > { %p2733_p8 = por %p152_p5, %p151_p3  ;;  %p197_p9 = scmp.lt.s32.totalorder %s2655_s17, 3 }
   0xc   : > { %s2739_s25 = scalar_select %p133_p7, %s2643_s14, %s135_s21  }
   0xd   : > { %p198_p10 = pnand %p2245_p6, %p197_p9 }
   0xf   : > { %201 = sbr.rel (%p198_p10) target bundleno = 957 (0x3bd), region = 32 }
  0x14   : > { %p234_p11 = scmp.lt.s32.totalorder %s2647_s15, 1  ;;  %s2657_s4 = smov 8   ;;  %vm1574_vm0 = vcmask 64512   ;;  %vm1607_vm1 = vcmask 130048   ;;  %vm1640_vm2 = vcmask 195584   ;;  %vm1673_vm3 = vcmask 261120  }
  0x15   : > { %s2658_s5 = smov 16   ;;  %s2659_s6 = smov 24   ;;  %vm1706_vm4 = vcmask 326656   ;;  %vm1739_vm5 = vcmask 392192   ;;  %vm1772_vm6 = vcmask 457728   ;;  %vm1805_vm7 = vcmask 523264  }
  0x16   : > { %s235_s26 = scalar_select %p234_p11, %s2647_s15, 1  ;;  %vm1851_vm8 = vcmask 588800  }
  0x17   : > { %s2660_s7 = smov 32   ;;  %s2661_s8 = smov 40  }
  0x18   : > { %s2505_s27 = smul.u32 432, %s235_s26  ;;  %s2662_s9 = smov 48  }
  0x19   : > { %s2663_s10 = smov 64   ;;  %s2664_s11 = smov 56  }
  0x1a   : > { %s2746_s30 = scalar_lea.vmem %s4531_s0, %s2505_s27  ;;  %s2477_s29 = sshll.u32 %s2647_s15, 8 }
  0x1b   : > { %v2749_v0 = vld [vmem:[%s2746_s30 + $0x31] sm:$0xff]  ;;  %v2752_v1 = vld [vmem:[%s2746_s30 + $0x19] sm:$0xff]  ;;  %v288_v2 = vld [vmem:[%s2746_s30 + $0x1] sm:$0xff]  ;;  %s2597_s27 = scalar_lea.hbm %s4534_s3, 512 }
  0x1c   : > { %590 = vrot.lane.b32.xlu2 %v2749_v0, %s2657_s4  ;;  %586 = vrot.lane.b32.xlu1 %v2752_v1, %s2657_s4  ;;  %v2761_v3 = vld [vmem:[%s2746_s30 + $0x39] sm:$0xff]  ;;  %v2764_v4 = vld [vmem:[%s2746_s30 + $0x21] sm:$0xff] }
  0x1d   : > { %582 = vrot.lane.b32.xlu0 %v288_v2, %s2657_s4  ;;  %v289_v5 = vld [vmem:[%s2746_s30 + $0x9] sm:$0xff]  ;;  %v2773_v6 = vld [vmem:[%s2746_s30 + $0x61] sm:$0xff]  ;;  %v2776_v7 = vld [vmem:[%s2746_s30 + $0x51] sm:$0xff] }
  0x1e   : > { %v2779_v8 = vld [vmem:[%s2746_s30 + $0x49] sm:$0xff]  ;;  %v2788_v9 = vld [vmem:[%s2746_s30 + $0x81] sm:$0xff]  ;;  %v2791_v10 = vld [vmem:[%s2746_s30 + $0x79] sm:$0xff] }
  0x1f   : > { %v2794_v11 = vld [vmem:[%s2746_s30 + $0x69] sm:$0xff]  ;;  %v2806_v13 = vld [vmem:[%s2746_s30 + $0x99] sm:$0xff]  ;;  %v2809_v14 = vld [vmem:[%s2746_s30 + $0x91] sm:$0xff] }
  0x20   : > { %v2803_v12 = vld [vmem:[%s2746_s30 + $0xa9] sm:$0xff]  ;;  %v2821_v16 = vld [vmem:[%s2746_s30 + $0xc1] sm:$0xff]  ;;  %v2824_v17 = vld [vmem:[%s2746_s30 + $0xb1] sm:$0xff] }
  0x21   : > { %v2818_v15 = vld [vmem:[%s2746_s30 + $0xc9] sm:$0xff]  ;;  %v2833_v18 = vld [vmem:[%s2746_s30 + $0xf1] sm:$0xff]  ;;  %v2836_v19 = vld [vmem:[%s2746_s30 + $0xe1] sm:$0xff] }
  0x22   : > { %v2839_v20 = vld [vmem:[%s2746_s30 + $0xd9] sm:$0xff]  ;;  %v2848_v21 = vld [vmem:[%s2746_s30 + $0x111] sm:$0xff]  ;;  %v2851_v22 = vld [vmem:[%s2746_s30 + $0x109] sm:$0xff] }
  0x23   : > { %v2854_v23 = vld [vmem:[%s2746_s30 + $0xf9] sm:$0xff]  ;;  %v2866_v25 = vld [vmem:[%s2746_s30 + $0x129] sm:$0xff]  ;;  %v2869_v26 = vld [vmem:[%s2746_s30 + $0x121] sm:$0xff] }
  0x24   : > { %592 = vrot.lane.b32.xlu2 %v2761_v3, %s2657_s4  ;;  %588 = vrot.lane.b32.xlu1 %v2764_v4, %s2657_s4  ;;  %v2863_v24 = vld [vmem:[%s2746_s30 + $0x139] sm:$0xff]  ;;  %v2881_v28 = vld [vmem:[%s2746_s30 + $0x151] sm:$0xff] }
  0x25   : > { %584 = vrot.lane.b32.xlu0 %v289_v5, %s2657_s4  ;;  %v2878_v27 = vld [vmem:[%s2746_s30 + $0x159] sm:$0xff]  ;;  %v2884_v29 = vld [vmem:[%s2746_s30 + $0x141] sm:$0xff]  ;;  %v2894_v31 = vld [vmem:[%s2746_s30 + $0x171] sm:$0xff] }
  0x26   : > { %v320_v30 = vld [vmem:[%s2746_s30 + $0x2] sm:$0xff]  ;;  %v2908_v34 = vld [vmem:[%s2746_s30 + $0x1a] sm:$0xff]  ;;  %v321_v35 = vld [vmem:[%s2746_s30 + $0xa] sm:$0xff] }
  0x27   : > { %v2897_v32 = vld [vmem:[%s2746_s30 + $0x169] sm:$0xff]  ;;  %v2922_v38 = vld [vmem:[%s2746_s30 + $0x3a] sm:$0xff]  ;;  %v2925_v39 = vld [vmem:[%s2746_s30 + $0x32] sm:$0xff] }
  0x28   : > { %v2905_v33 = vld [vmem:[%s2746_s30 + $0x22] sm:$0xff]  ;;  %v2919_v37 = vld [vmem:[%s2746_s30 + $0x4a] sm:$0xff]  ;;  %v2942_v43 = vld [vmem:[%s2746_s30 + $0x52] sm:$0xff] }
  0x29   : > { %v2936_v41 = vld [vmem:[%s2746_s30 + $0x6a] sm:$0xff]  ;;  %v2939_v42 = vld [vmem:[%s2746_s30 + $0x62] sm:$0xff]  ;;  %v2953_v45 = vld [vmem:[%s2746_s30 + $0x92] sm:$0xff] }
  0x2a   : > { %v2956_v46 = vld [vmem:[%s2746_s30 + $0x82] sm:$0xff]  ;;  %v2959_v47 = vld [vmem:[%s2746_s30 + $0x7a] sm:$0xff]  ;;  %v2974_v51 = vld [vmem:[%s2746_s30 + $0xb2] sm:$0xff] }
  0x2b   : > { %v2977_v52 = vld [vmem:[%s2746_s30 + $0xaa] sm:$0xff]  ;;  %v2980_v53 = vld [vmem:[%s2746_s30 + $0x9a] sm:$0xff]  ;;  %v3001_v59 = vld [vmem:[%s2746_s30 + $0xc2] sm:$0xff] }
  0x2c   : > { %598 = vrot.lane.b32.xlu2 %v2773_v6, %s2657_s4  ;;  %596 = vrot.lane.b32.xlu1 %v2776_v7, %s2657_s4  ;;  %v2995_v57 = vld [vmem:[%s2746_s30 + $0xda] sm:$0xff]  ;;  %v2998_v58 = vld [vmem:[%s2746_s30 + $0xca] sm:$0xff] }
  0x2d   : > { %594 = vrot.lane.b32.xlu0 %v2779_v8, %s2657_s4  ;;  %v3016_v63 = vld [vmem:[%s2746_s30 + $0xfa] sm:$0xff]  ;;  %v3019_v2 = vld [vmem:[%s2746_s30 + $0xf2] sm:$0xff]  ;;  %v3022_v5 = vld [vmem:[%s2746_s30 + $0xe2] sm:$0xff] }
  0x34   : > { %604 = vrot.lane.b32.xlu2 %v2788_v9, %s2657_s4  ;;  %602 = vrot.lane.b32.xlu1 %v2791_v10, %s2657_s4 }
  0x35   : > { %600 = vrot.lane.b32.xlu0 %v2794_v11, %s2657_s4 }
  0x3c   : > { %610 = vrot.lane.b32.xlu2 %v2803_v12, %s2657_s4  ;;  %608 = vrot.lane.b32.xlu1 %v2806_v13, %s2657_s4 }
  0x3d   : > { %606 = vrot.lane.b32.xlu0 %v2809_v14, %s2657_s4 }
  0x44   : > { %616 = vrot.lane.b32.xlu2 %v2818_v15, %s2657_s4  ;;  %614 = vrot.lane.b32.xlu1 %v2821_v16, %s2657_s4 }
  0x45   : > { %612 = vrot.lane.b32.xlu0 %v2824_v17, %s2657_s4 }
  0x4c   : > { %622 = vrot.lane.b32.xlu2 %v2833_v18, %s2657_s4  ;;  %620 = vrot.lane.b32.xlu1 %v2836_v19, %s2657_s4 }
  0x4d   : > { %618 = vrot.lane.b32.xlu0 %v2839_v20, %s2657_s4 }
  0x54   : > { %628 = vrot.lane.b32.xlu2 %v2848_v21, %s2657_s4  ;;  %626 = vrot.lane.b32.xlu1 %v2851_v22, %s2657_s4 }
  0x55   : > { %624 = vrot.lane.b32.xlu0 %v2854_v23, %s2657_s4 }
  0x5c   : > { %634 = vrot.lane.b32.xlu2 %v2863_v24, %s2657_s4  ;;  %632 = vrot.lane.b32.xlu1 %v2866_v25, %s2657_s4 }
  0x5d   : > { %630 = vrot.lane.b32.xlu0 %v2869_v26, %s2657_s4 }
  0x64   : > { %640 = vrot.lane.b32.xlu2 %v2878_v27, %s2657_s4  ;;  %638 = vrot.lane.b32.xlu1 %v2881_v28, %s2657_s4 }
  0x65   : > { %636 = vrot.lane.b32.xlu0 %v2884_v29, %s2657_s4 }
  0x6c   : > { %710 = vrot.lane.b32.xlu2 %v320_v30, %s2658_s5  ;;  %644 = vrot.lane.b32.xlu1 %v2894_v31, %s2657_s4 }
  0x6d   : > { %642 = vrot.lane.b32.xlu0 %v2897_v32, %s2657_s4 }
  0x74   : > { %716 = vrot.lane.b32.xlu2 %v2905_v33, %s2658_s5  ;;  %714 = vrot.lane.b32.xlu1 %v2908_v34, %s2658_s5 }
  0x75   : > { %712 = vrot.lane.b32.xlu0 %v321_v35, %s2658_s5 }
  0x76   : > { %v2916_v36 = vpop.permute.xlu2 %590 }
  0x77   : > { %4582 = vst [vmem:[#allocation5_spill] sm:$0xff] %v2916_v36  ;;  %v3061_v36 = vld [vmem:[%s2746_s30 + $0x13a] sm:$0xff] }
  0x7c   : > { %722 = vrot.lane.b32.xlu2 %v2919_v37, %s2658_s5  ;;  %720 = vrot.lane.b32.xlu1 %v2922_v38, %s2658_s5 }
  0x7d   : > { %718 = vrot.lane.b32.xlu0 %v2925_v39, %s2658_s5 }
  0x7e   : > { %v2933_v40 = vpop.permute.xlu2 %592 }
  0x7f   : > { %4583 = vst [vmem:[#allocation6_spill] sm:$0xff] %v2933_v40  ;;  %v3040_v40 = vld [vmem:[%s2746_s30 + $0x112] sm:$0xff] }
  0x84   : > { %728 = vrot.lane.b32.xlu2 %v2936_v41, %s2658_s5  ;;  %726 = vrot.lane.b32.xlu1 %v2939_v42, %s2658_s5 }
  0x85   : > { %724 = vrot.lane.b32.xlu0 %v2942_v43, %s2658_s5 }
  0x86   : > { %v2950_v44 = vpop.permute.xlu2 %598 }
  0x87   : > { %4584 = vst [vmem:[#allocation7_spill] sm:$0xff] %v2950_v44 }
  0x8c   : > { %734 = vrot.lane.b32.xlu2 %v2953_v45, %s2658_s5  ;;  %732 = vrot.lane.b32.xlu1 %v2956_v46, %s2658_s5 }
  0x8d   : > { %730 = vrot.lane.b32.xlu0 %v2959_v47, %s2658_s5 }
  0x8e   : > { %v2967_v48 = vpop.permute.xlu2 %604  ;;  %v2969_v49 = vpop.permute.xlu1 %586 }
  0x8f   : > { %4585 = vst [vmem:[#allocation8_spill] sm:$0xff] %v2967_v48  ;;  %v2971_v50 = vpop.permute.xlu0 %582  ;;  %v3037_v48 = vld [vmem:[%s2746_s30 + $0x122] sm:$0xff] }
  0x90   : > { %4586 = vst [vmem:[#allocation9_spill] sm:$0xff] %v2969_v49  ;;  %v3100_v49 = vld [vmem:[%s2746_s30 + $0x172] sm:$0xff] }
  0x91   : > { %4587 = vst [vmem:[#allocation10_spill] sm:$0xff] %v2971_v50 }
  0x92   : > { %4610 = vst [vmem:[#allocation33_spill] sm:$0xff] %v3100_v49 }
  0x94   : > { %740 = vrot.lane.b32.xlu2 %v2974_v51, %s2658_s5  ;;  %738 = vrot.lane.b32.xlu1 %v2977_v52, %s2658_s5 }
  0x95   : > { %736 = vrot.lane.b32.xlu0 %v2980_v53, %s2658_s5 }
  0x96   : > { %v2988_v54 = vpop.permute.xlu2 %610  ;;  %v2990_v55 = vpop.permute.xlu1 %588 }
  0x97   : > { %4588 = vst [vmem:[#allocation11_spill] sm:$0xff] %v2988_v54  ;;  %v2992_v56 = vpop.permute.xlu0 %584  ;;  %v3085_v54 = vld [vmem:[%s2746_s30 + $0x152] sm:$0xff] }
  0x98   : > { %4589 = vst [vmem:[#allocation12_spill] sm:$0xff] %v2990_v55  ;;  %v3103_v55 = vld [vmem:[%s2746_s30 + $0x18] sm:$0xff] }
  0x99   : > { %4590 = vst [vmem:[#allocation13_spill] sm:$0xff] %v2992_v56  ;;  %v3064_v56 = vld [vmem:[%s2746_s30 + $0x12a] sm:$0xff] }
  0x9a   : > { %4606 = vst [vmem:[#allocation29_spill] sm:$0xff] %v3085_v54 }
  0x9b   : > { %4611 = vst [vmem:[#allocation34_spill] sm:$0xff] %v3103_v55 }
  0x9c   : > { %746 = vrot.lane.b32.xlu2 %v2995_v57, %s2658_s5  ;;  %744 = vrot.lane.b32.xlu1 %v2998_v58, %s2658_s5 }
  0x9d   : > { %742 = vrot.lane.b32.xlu0 %v3001_v59, %s2658_s5 }
  0x9e   : > { %v3009_v60 = vpop.permute.xlu2 %616  ;;  %v3011_v61 = vpop.permute.xlu1 %596 }
  0x9f   : > { %4591 = vst [vmem:[#allocation14_spill] sm:$0xff] %v3009_v60  ;;  %v3013_v62 = vpop.permute.xlu0 %594  ;;  %v3079_v60 = vld [vmem:[%s2746_s30 + $0x16a] sm:$0xff] }
  0xa0   : > { %4592 = vst [vmem:[#allocation15_spill] sm:$0xff] %v3011_v61  ;;  %v3058_v61 = vld [vmem:[%s2746_s30 + $0x142] sm:$0xff] }
  0xa1   : > { %4593 = vst [vmem:[#allocation16_spill] sm:$0xff] %v3013_v62  ;;  %v3043_v62 = vld [vmem:[%s2746_s30 + $0x10a] sm:$0xff] }
  0xa2   : > { %4600 = vst [vmem:[#allocation23_spill] sm:$0xff] %v3058_v61 }
  0xa3   : > { %4604 = vst [vmem:[#allocation27_spill] sm:$0xff] %v3079_v60 }
  0xa4   : > { %752 = vrot.lane.b32.xlu2 %v3016_v63, %s2658_s5  ;;  %750 = vrot.lane.b32.xlu1 %v3019_v2, %s2658_s5 }
  0xa5   : > { %748 = vrot.lane.b32.xlu0 %v3022_v5, %s2658_s5 }
  0xa6   : > { %v3030_v30 = vpop.permute.xlu2 %622  ;;  %v3032_v35 = vpop.permute.xlu1 %602 }
  0xa7   : > { %4594 = vst [vmem:[#allocation17_spill] sm:$0xff] %v3030_v30  ;;  %v3034_v44 = vpop.permute.xlu0 %600 }
  0xa8   : > { %4595 = vst [vmem:[#allocation18_spill] sm:$0xff] %v3032_v35 }
  0xa9   : > { %4596 = vst [vmem:[#allocation19_spill] sm:$0xff] %v3034_v44 }
  0xac   : > { %758 = vrot.lane.b32.xlu2 %v3037_v48, %s2658_s5  ;;  %756 = vrot.lane.b32.xlu1 %v3040_v40, %s2658_s5 }
  0xad   : > { %754 = vrot.lane.b32.xlu0 %v3043_v62, %s2658_s5 }
  0xae   : > { %v3051_v35 = vpop.permute.xlu2 %628  ;;  %v3053_v44 = vpop.permute.xlu1 %608 }
  0xaf   : > { %4597 = vst [vmem:[#allocation20_spill] sm:$0xff] %v3051_v35  ;;  %v3055_v50 = vpop.permute.xlu0 %606 }
  0xb0   : > { %4598 = vst [vmem:[#allocation21_spill] sm:$0xff] %v3053_v44  ;;  %v3082_v44 = vld [vmem:[%s2746_s30 + $0x15a] sm:$0xff] }
  0xb1   : > { %4599 = vst [vmem:[#allocation22_spill] sm:$0xff] %v3055_v50 }
  0xb2   : > { %4605 = vst [vmem:[#allocation28_spill] sm:$0xff] %v3082_v44 }
  0xb4   : > { %764 = vrot.lane.b32.xlu2 %v3058_v61, %s2658_s5  ;;  %762 = vrot.lane.b32.xlu1 %v3061_v36, %s2658_s5  ;;  %v261_v61 = vld [vmem:[%s2746_s30 + $0x38] sm:$0xff] }
  0xb5   : > { %760 = vrot.lane.b32.xlu0 %v3064_v56, %s2658_s5 }
  0xb6   : > { %v3072_v35 = vpop.permute.xlu2 %634  ;;  %v3074_v50 = vpop.permute.xlu1 %614 }
  0xb7   : > { %4601 = vst [vmem:[#allocation24_spill] sm:$0xff] %v3072_v35  ;;  %v3076_v30 = vpop.permute.xlu0 %612 }
  0xb8   : > { %4602 = vst [vmem:[#allocation25_spill] sm:$0xff] %v3074_v50 }
  0xb9   : > { %4603 = vst [vmem:[#allocation26_spill] sm:$0xff] %v3076_v30 }
  0xbc   : > { %770 = vrot.lane.b32.xlu2 %v3079_v60, %s2658_s5  ;;  %768 = vrot.lane.b32.xlu1 %v3082_v44, %s2658_s5  ;;  %v3106_v60 = vld [vmem:[%s2746_s30 + $0x20] sm:$0xff]  ;;  %v3125_v44 = vld [vmem:[%s2746_s30 + $0x30] sm:$0xff] }
  0xbd   : > { %766 = vrot.lane.b32.xlu0 %v3085_v54, %s2658_s5  ;;  %4612 = vst [vmem:[#allocation35_spill] sm:$0xff] %v3106_v60  ;;  %v3122_v54 = vld [vmem:[%s2746_s30 + $0x48] sm:$0xff] }
  0xbe   : > { %v3093_v35 = vpop.permute.xlu2 %640  ;;  %v3095_v50 = vpop.permute.xlu1 %620  ;;  %4616 = vst [vmem:[#allocation39_spill] sm:$0xff] %v3122_v54 }
  0xbf   : > { %4607 = vst [vmem:[#allocation30_spill] sm:$0xff] %v3093_v35  ;;  %v3097_v30 = vpop.permute.xlu0 %618 }
  0xc0   : > { %4608 = vst [vmem:[#allocation31_spill] sm:$0xff] %v3095_v50 }
  0xc1   : > { %4609 = vst [vmem:[#allocation32_spill] sm:$0xff] %v3097_v30 }
  0xc2   : > { %4617 = vst [vmem:[#allocation40_spill] sm:$0xff] %v3125_v44 }
  0xc4   : > { %840 = vrot.lane.b32.xlu2 %v3106_v60, %s2659_s6  ;;  %838 = vrot.lane.b32.xlu1 %v3103_v55, %s2659_s6  ;;  %v264_v55 = vld [vmem:[%s2746_s30 + $0x60] sm:$0xff]  ;;  %v3140_v60 = vld [vmem:[%s2746_s30 + $0x68] sm:$0xff] }
  0xc5   : > { %772 = vrot.lane.b32.xlu0 %v3100_v49, %s2658_s5  ;;  %4621 = vst [vmem:[#allocation44_spill] sm:$0xff] %v3140_v60  ;;  %v3143_v49 = vld [vmem:[%s2746_s30 + $0x50] sm:$0xff] }
  0xc6   : > { %v3114_v35 = vpop.permute.xlu2 %710  ;;  %v3116_v50 = vpop.permute.xlu1 %626  ;;  %4622 = vst [vmem:[#allocation45_spill] sm:$0xff] %v3143_v49 }
  0xc7   : > { %4613 = vst [vmem:[#allocation36_spill] sm:$0xff] %v3114_v35  ;;  %v3118_v30 = vpop.permute.xlu0 %624 }
  0xc8   : > { %4614 = vst [vmem:[#allocation37_spill] sm:$0xff] %v3116_v50 }
  0xc9   : > { %4615 = vst [vmem:[#allocation38_spill] sm:$0xff] %v3118_v30 }
  0xcc   : > { %846 = vrot.lane.b32.xlu2 %v3122_v54, %s2659_s6  ;;  %844 = vrot.lane.b32.xlu1 %v261_v61, %s2659_s6 }
  0xcd   : > { %842 = vrot.lane.b32.xlu0 %v3125_v44, %s2659_s6 }
  0xce   : > { %v3132_v35 = vpop.permute.xlu2 %716  ;;  %v3134_v50 = vpop.permute.xlu1 %632 }
  0xcf   : > { %4618 = vst [vmem:[#allocation41_spill] sm:$0xff] %v3132_v35  ;;  %v3136_v30 = vpop.permute.xlu0 %630  ;;  %v3161_v35 = vld [vmem:[%s2746_s30 + $0x78] sm:$0xff] }
  0xd0   : > { %4619 = vst [vmem:[#allocation42_spill] sm:$0xff] %v3134_v50  ;;  %v3158_v50 = vld [vmem:[%s2746_s30 + $0x90] sm:$0xff] }
  0xd1   : > { %4620 = vst [vmem:[#allocation43_spill] sm:$0xff] %v3136_v30  ;;  %v267_v30 = vld [vmem:[%s2746_s30 + $0x80] sm:$0xff] }
  0xd2   : > { %4626 = vst [vmem:[#allocation49_spill] sm:$0xff] %v3158_v50 }
  0xd3   : > { %4627 = vst [vmem:[#allocation50_spill] sm:$0xff] %v3161_v35 }
  0xd4   : > { %852 = vrot.lane.b32.xlu2 %v3140_v60, %s2659_s6  ;;  %850 = vrot.lane.b32.xlu1 %v264_v55, %s2659_s6  ;;  %v3175_v60 = vld [vmem:[%s2746_s30 + $0xa8] sm:$0xff] }
  0xd5   : > { %848 = vrot.lane.b32.xlu0 %v3143_v49, %s2659_s6  ;;  %4631 = vst [vmem:[#allocation54_spill] sm:$0xff] %v3175_v60  ;;  %v3181_v49 = vld [vmem:[%s2746_s30 + $0x98] sm:$0xff] }
  0xd6   : > { %v3150_v61 = vpop.permute.xlu2 %722  ;;  %v3152_v44 = vpop.permute.xlu1 %638  ;;  %4633 = vst [vmem:[#allocation56_spill] sm:$0xff] %v3181_v49 }
  0xd7   : > { %4623 = vst [vmem:[#allocation46_spill] sm:$0xff] %v3150_v61  ;;  %v3154_v54 = vpop.permute.xlu0 %636 }
  0xd8   : > { %4624 = vst [vmem:[#allocation47_spill] sm:$0xff] %v3152_v44 }
  0xd9   : > { %4625 = vst [vmem:[#allocation48_spill] sm:$0xff] %v3154_v54  ;;  %v3178_v54 = vld [vmem:[%s2746_s30 + $0xb0] sm:$0xff] }
  0xda   : > { %4632 = vst [vmem:[#allocation55_spill] sm:$0xff] %v3178_v54 }
  0xdc   : > { %858 = vrot.lane.b32.xlu2 %v3158_v50, %s2659_s6  ;;  %856 = vrot.lane.b32.xlu1 %v267_v30, %s2659_s6  ;;  %v3196_v50 = vld [vmem:[%s2746_s30 + $0xc8] sm:$0xff] }
  0xdd   : > { %854 = vrot.lane.b32.xlu0 %v3161_v35, %s2659_s6  ;;  %4637 = vst [vmem:[#allocation60_spill] sm:$0xff] %v3196_v50  ;;  %v3202_v35 = vld [vmem:[%s2746_s30 + $0xc0] sm:$0xff] }
  0xde   : > { %v3168_v55 = vpop.permute.xlu2 %728  ;;  %v3170_v61 = vpop.permute.xlu1 %644  ;;  %4639 = vst [vmem:[#allocation62_spill] sm:$0xff] %v3202_v35 }
  0xdf   : > { %4628 = vst [vmem:[#allocation51_spill] sm:$0xff] %v3168_v55  ;;  %v3172_v44 = vpop.permute.xlu0 %642 }
  0xe0   : > { %4629 = vst [vmem:[#allocation52_spill] sm:$0xff] %v3170_v61  ;;  %v3199_v61 = vld [vmem:[%s2746_s30 + $0xd8] sm:$0xff] }
  0xe1   : > { %4630 = vst [vmem:[#allocation53_spill] sm:$0xff] %v3172_v44 }
  0xe2   : > { %4638 = vst [vmem:[#allocation61_spill] sm:$0xff] %v3199_v61 }
  0xe4   : > { %864 = vrot.lane.b32.xlu2 %v3178_v54, %s2659_s6  ;;  %862 = vrot.lane.b32.xlu1 %v3175_v60, %s2659_s6  ;;  %v3217_v54 = vld [vmem:[%s2746_s30 + $0xf0] sm:$0xff] }
  0xe5   : > { %860 = vrot.lane.b32.xlu0 %v3181_v49, %s2659_s6  ;;  %4643 = vst [vmem:[#allocation66_spill] sm:$0xff] %v3217_v54  ;;  %v3223_v49 = vld [vmem:[%s2746_s30 + $0xe0] sm:$0xff] }
  0xe6   : > { %v3189_v30 = vpop.permute.xlu2 %734  ;;  %v3191_v55 = vpop.permute.xlu1 %714  ;;  %4645 = vst [vmem:[#allocation68_spill] sm:$0xff] %v3223_v49 }
  0xe7   : > { %4634 = vst [vmem:[#allocation57_spill] sm:$0xff] %v3189_v30  ;;  %v3193_v44 = vpop.permute.xlu0 %712 }
  0xe8   : > { %4635 = vst [vmem:[#allocation58_spill] sm:$0xff] %v3191_v55  ;;  %v3220_v55 = vld [vmem:[%s2746_s30 + $0xf8] sm:$0xff] }
  0xe9   : > { %4636 = vst [vmem:[#allocation59_spill] sm:$0xff] %v3193_v44 }
  0xea   : > { %4644 = vst [vmem:[#allocation67_spill] sm:$0xff] %v3220_v55 }
  0xec   : > { %870 = vrot.lane.b32.xlu2 %v3199_v61, %s2659_s6  ;;  %868 = vrot.lane.b32.xlu1 %v3196_v50, %s2659_s6  ;;  %v3238_v61 = vld [vmem:[%s2746_s30 + $0x110] sm:$0xff] }
  0xed   : > { %866 = vrot.lane.b32.xlu0 %v3202_v35, %s2659_s6  ;;  %4649 = vst [vmem:[#allocation72_spill] sm:$0xff] %v3238_v61  ;;  %v3244_v35 = vld [vmem:[%s2746_s30 + $0x108] sm:$0xff] }
  0xee   : > { %v3210_v30 = vpop.permute.xlu2 %740  ;;  %v3212_v44 = vpop.permute.xlu1 %720  ;;  %4651 = vst [vmem:[#allocation74_spill] sm:$0xff] %v3244_v35 }
  0xef   : > { %4640 = vst [vmem:[#allocation63_spill] sm:$0xff] %v3210_v30  ;;  %v3214_v60 = vpop.permute.xlu0 %718  ;;  %v3241_v30 = vld [vmem:[%s2746_s30 + $0x120] sm:$0xff] }
  0xf0   : > { %4641 = vst [vmem:[#allocation64_spill] sm:$0xff] %v3212_v44 }
  0xf1   : > { %4642 = vst [vmem:[#allocation65_spill] sm:$0xff] %v3214_v60 }
  0xf2   : > { %4650 = vst [vmem:[#allocation73_spill] sm:$0xff] %v3241_v30 }
  0xf4   : > { %876 = vrot.lane.b32.xlu2 %v3220_v55, %s2659_s6  ;;  %874 = vrot.lane.b32.xlu1 %v3217_v54, %s2659_s6  ;;  %v3259_v55 = vld [vmem:[%s2746_s30 + $0x138] sm:$0xff] }
  0xf5   : > { %872 = vrot.lane.b32.xlu0 %v3223_v49, %s2659_s6  ;;  %4655 = vst [vmem:[#allocation78_spill] sm:$0xff] %v3259_v55  ;;  %v3265_v49 = vld [vmem:[%s2746_s30 + $0x128] sm:$0xff] }
  0xf6   : > { %v3231_v44 = vpop.permute.xlu2 %746  ;;  %v3233_v60 = vpop.permute.xlu1 %726  ;;  %4657 = vst [vmem:[#allocation80_spill] sm:$0xff] %v3265_v49 }
  0xf7   : > { %4646 = vst [vmem:[#allocation69_spill] sm:$0xff] %v3231_v44  ;;  %v3235_v50 = vpop.permute.xlu0 %724  ;;  %v3262_v44 = vld [vmem:[%s2746_s30 + $0x140] sm:$0xff] }
  0xf8   : > { %4647 = vst [vmem:[#allocation70_spill] sm:$0xff] %v3233_v60 }
  0xf9   : > { %4648 = vst [vmem:[#allocation71_spill] sm:$0xff] %v3235_v50 }
  0xfa   : > { %4656 = vst [vmem:[#allocation79_spill] sm:$0xff] %v3262_v44 }
  0xfc   : > { %882 = vrot.lane.b32.xlu2 %v3241_v30, %s2659_s6  ;;  %880 = vrot.lane.b32.xlu1 %v3238_v61, %s2659_s6  ;;  %v3286_v30 = vld [vmem:[%s2746_s30 + $0x150] sm:$0xff] }
  0xfd   : > { %878 = vrot.lane.b32.xlu0 %v3244_v35, %s2659_s6  ;;  %v3283_v35 = vld [vmem:[%s2746_s30 + $0x168] sm:$0xff] }
  0xfe   : > { %v3252_v60 = vpop.permute.xlu2 %752  ;;  %v3254_v50 = vpop.permute.xlu1 %732  ;;  %4662 = vst [vmem:[#allocation85_spill] sm:$0xff] %v3283_v35 }
  0xff   : > { %4652 = vst [vmem:[#allocation75_spill] sm:$0xff] %v3252_v60  ;;  %v3256_v54 = vpop.permute.xlu0 %730  ;;  %v3280_v60 = vld [vmem:[%s2746_s30 + $0x158] sm:$0xff] }
 0x100   : > { %4653 = vst [vmem:[#allocation76_spill] sm:$0xff] %v3254_v50 }
 0x101   : > { %4654 = vst [vmem:[#allocation77_spill] sm:$0xff] %v3256_v54 }
 0x102   : > { %4661 = vst [vmem:[#allocation84_spill] sm:$0xff] %v3280_v60 }
 0x104   : > { %888 = vrot.lane.b32.xlu2 %v3262_v44, %s2659_s6  ;;  %886 = vrot.lane.b32.xlu1 %v3259_v55, %s2659_s6  ;;  %v2279_v44 = vld [vmem:[%s2746_s30 + $0x188] sm:$0xff] }
 0x105   : > { %884 = vrot.lane.b32.xlu0 %v3265_v49, %s2659_s6  ;;  %v3305_v49 = vld [vmem:[%s2746_s30 + $0x170] sm:$0xff] }
 0x106   : > { %v3273_v50 = vpop.permute.xlu2 %758  ;;  %v3275_v54 = vpop.permute.xlu1 %738 }
 0x107   : > { %4658 = vst [vmem:[#allocation81_spill] sm:$0xff] %v3273_v50  ;;  %v3277_v61 = vpop.permute.xlu0 %736  ;;  %v3302_v50 = vld [vmem:[%s2746_s30 + $0x180] sm:$0xff] }
 0x108   : > { %4659 = vst [vmem:[#allocation82_spill] sm:$0xff] %v3275_v54 }
 0x109   : > { %4660 = vst [vmem:[#allocation83_spill] sm:$0xff] %v3277_v61 }
 0x10a   : > { %4665 = vst [vmem:[#allocation88_spill] sm:$0xff] %v3302_v50 }
 0x10c   : > { %894 = vrot.lane.b32.xlu2 %v3283_v35, %s2659_s6  ;;  %892 = vrot.lane.b32.xlu1 %v3280_v60, %s2659_s6 }
 0x10d   : > { %890 = vrot.lane.b32.xlu0 %v3286_v30, %s2659_s6 }
 0x10e   : > { %v3294_v55 = vpop.permute.xlu2 %764  ;;  %v3296_v54 = vpop.permute.xlu1 %744 }
 0x10f   : > { %4663 = vst [vmem:[#allocation86_spill] sm:$0xff] %v3296_v54  ;;  %v3298_v61 = vpop.permute.xlu0 %742 }
 0x110   : > { %4664 = vst [vmem:[#allocation87_spill] sm:$0xff] %v3298_v61 }
 0x114   : > { %900 = vrot.lane.b32.xlu2 %v2279_v44, %s2659_s6  ;;  %898 = vrot.lane.b32.xlu1 %v3302_v50, %s2659_s6 }
 0x115   : > { %896 = vrot.lane.b32.xlu0 %v3305_v49, %s2659_s6 }
 0x116   : > { %v3312_v60 = vpop.permute.xlu2 %770  ;;  %v3314_v35 = vpop.permute.xlu1 %750 }
 0x117   : > { %v3316_v54 = vpop.permute.xlu0 %748 }
 0x11c   : > { %970 = vrot.lane.b32.xlu2 %v2749_v0, %s2660_s7  ;;  %968 = vrot.lane.b32.xlu1 %v2764_v4, %s2660_s7 }
 0x11d   : > { %966 = vrot.lane.b32.xlu0 %v2752_v1, %s2660_s7 }
 0x11e   : > { %v3324_v44 = vpop.permute.xlu2 %840  ;;  %v3326_v50 = vpop.permute.xlu1 %756 }
 0x11f   : > { %v3328_v61 = vpop.permute.xlu0 %754 }
 0x124   : > { %976 = vrot.lane.b32.xlu2 %v2776_v7, %s2660_s7  ;;  %974 = vrot.lane.b32.xlu1 %v2779_v8, %s2660_s7 }
 0x125   : > { %972 = vrot.lane.b32.xlu0 %v2761_v3, %s2660_s7 }
 0x126   : > { %v3336_v0 = vpop.permute.xlu2 %846  ;;  %v3338_v4 = vpop.permute.xlu1 %762 }
 0x127   : > { %v3340_v1 = vpop.permute.xlu0 %760 }
 0x12c   : > { %982 = vrot.lane.b32.xlu2 %v2791_v10, %s2660_s7  ;;  %980 = vrot.lane.b32.xlu1 %v2794_v11, %s2660_s7 }
 0x12d   : > { %978 = vrot.lane.b32.xlu0 %v2773_v6, %s2660_s7 }
 0x12e   : > { %v3348_v7 = vpop.permute.xlu2 %852  ;;  %v3350_v8 = vpop.permute.xlu1 %768 }
 0x12f   : > { %v3352_v3 = vpop.permute.xlu0 %766 }
 0x134   : > { %988 = vrot.lane.b32.xlu2 %v2806_v13, %s2660_s7  ;;  %986 = vrot.lane.b32.xlu1 %v2809_v14, %s2660_s7 }
 0x135   : > { %984 = vrot.lane.b32.xlu0 %v2788_v9, %s2660_s7 }
 0x136   : > { %v3360_v10 = vpop.permute.xlu2 %858  ;;  %v3362_v11 = vpop.permute.xlu1 %838 }
 0x137   : > { %4666 = vst [vmem:[#allocation89_spill] sm:$0xff] %v3360_v10  ;;  %v3364_v6 = vpop.permute.xlu0 %772  ;;  %v4698_v10 = vld [vmem:[#allocation41_spill] sm:$0xff] }
 0x138   : > { %4667 = vst [vmem:[#allocation90_spill] sm:$0xff] %v3362_v11 }
 0x13c   : > { %994 = vrot.lane.b32.xlu2 %v2821_v16, %s2660_s7  ;;  %992 = vrot.lane.b32.xlu1 %v2824_v17, %s2660_s7 }
 0x13d   : > { %990 = vrot.lane.b32.xlu0 %v2803_v12, %s2660_s7 }
 0x13e   : > { %v3372_v13 = vpop.permute.xlu2 %864  ;;  %v3374_v14 = vpop.permute.xlu1 %844 }
 0x13f   : > { %v3376_v9 = vpop.permute.xlu0 %842 }
 0x144   : > { %1000 = vrot.lane.b32.xlu2 %v2836_v19, %s2660_s7  ;;  %998 = vrot.lane.b32.xlu1 %v2839_v20, %s2660_s7 }
 0x145   : > { %996 = vrot.lane.b32.xlu0 %v2818_v15, %s2660_s7 }
 0x146   : > { %v3384_v16 = vpop.permute.xlu2 %870  ;;  %v3386_v17 = vpop.permute.xlu1 %850 }
 0x147   : > { %4668 = vst [vmem:[#allocation91_spill] sm:$0xff] %v3386_v17  ;;  %v3388_v12 = vpop.permute.xlu0 %848  ;;  %v2348_v17 = vld [vmem:[%s2746_s30 + $0x60] sm:$0xff] }
 0x148   : > { %4669 = vst [vmem:[#allocation92_spill] sm:$0xff] %v3388_v12  ;;  %v3580_v12 = vld [vmem:[%s2746_s30 + $0x18a] sm:$0xff] }
 0x14c   : > { %1006 = vrot.lane.b32.xlu2 %v2851_v22, %s2660_s7  ;;  %1004 = vrot.lane.b32.xlu1 %v2854_v23, %s2660_s7 }
 0x14d   : > { %1002 = vrot.lane.b32.xlu0 %v2833_v18, %s2660_s7 }
 0x14e   : > { %v3396_v19 = vpop.permute.xlu2 %876  ;;  %v3398_v20 = vpop.permute.xlu1 %856 }
 0x14f   : > { %4670 = vst [vmem:[#allocation93_spill] sm:$0xff] %v3398_v20  ;;  %v3400_v15 = vpop.permute.xlu0 %854  ;;  %v3439_v20 = vld [vmem:[%s2746_s30 + $0x189] sm:$0xff] }
 0x150   : > { %4671 = vst [vmem:[#allocation94_spill] sm:$0xff] %v3400_v15  ;;  %v3442_v15 = vld [vmem:[%s2746_s30 + $0x181] sm:$0xff] }
 0x151   : > { %4675 = vst [vmem:[#allocation98_spill] sm:$0xff] %v3439_v20 }
 0x152   : > { %4676 = vst [vmem:[#allocation99_spill] sm:$0xff] %v3442_v15 }
 0x154   : > { %1012 = vrot.lane.b32.xlu2 %v2866_v25, %s2660_s7  ;;  %1010 = vrot.lane.b32.xlu1 %v2869_v26, %s2660_s7 }
 0x155   : > { %1008 = vrot.lane.b32.xlu0 %v2848_v21, %s2660_s7 }
 0x156   : > { %v3408_v22 = vpop.permute.xlu2 %882  ;;  %v3410_v18 = vpop.permute.xlu1 %862 }
 0x157   : > { %4672 = vst [vmem:[#allocation95_spill] sm:$0xff] %v3410_v18  ;;  %v3412_v23 = vpop.permute.xlu0 %860 }
 0x158   : > { %4673 = vst [vmem:[#allocation96_spill] sm:$0xff] %v3412_v23  ;;  %v3563_v23 = vld [vmem:[%s2746_s30 + $0x182] sm:$0xff] }
 0x15c   : > { %1018 = vrot.lane.b32.xlu2 %v2881_v28, %s2660_s7  ;;  %1016 = vrot.lane.b32.xlu1 %v2884_v29, %s2660_s7 }
 0x15d   : > { %1014 = vrot.lane.b32.xlu0 %v2863_v24, %s2660_s7 }
 0x15e   : > { %v3420_v25 = vpop.permute.xlu2 %888  ;;  %v3422_v21 = vpop.permute.xlu1 %868 }
 0x15f   : > { %v3424_v26 = vpop.permute.xlu0 %866 }
 0x164   : > { %1024 = vrot.lane.b32.xlu2 %v2894_v31, %s2660_s7  ;;  %1022 = vrot.lane.b32.xlu1 %v2897_v32, %s2660_s7 }
 0x165   : > { %1020 = vrot.lane.b32.xlu0 %v2878_v27, %s2660_s7 }
 0x166   : > { %v3432_v28 = vpop.permute.xlu2 %894  ;;  %v3434_v29 = vpop.permute.xlu1 %874 }
 0x167   : > { %4674 = vst [vmem:[#allocation97_spill] sm:$0xff] %v3432_v28  ;;  %v3436_v24 = vpop.permute.xlu0 %872  ;;  %v4702_v28 = vld [vmem:[#allocation43_spill] sm:$0xff] }
 0x16c   : > { %1094 = vrot.lane.b32.xlu2 %v2908_v34, %s2661_s8  ;;  %1028 = vrot.lane.b32.xlu1 %v3439_v20, %s2660_s7 }
 0x16d   : > { %1026 = vrot.lane.b32.xlu0 %v3442_v15, %s2660_s7  ;;  %s2109_s7 = scalar_lea.hbm %s4534_s3, %s2477_s29 }
 0x16e   : > { %v3450_v27 = vpop.permute.xlu2 %900  ;;  %v3452_v31 = vpop.permute.xlu1 %880  ;;  %s2112_s18 = sshll.u32 %s2109_s7, 4  ;;  %s2113_s18 = int_to_ptr.hbm [resolvable:$true] %s2112_s18 }
 0x16f   : > { %v3454_v32 = vpop.permute.xlu0 %878  ;;  %s2591_s19 = sshra.s32 %s2113_s18, 4  ;;  %s2592_s19 = int_to_ptr.hbm [resolvable:$true] %s2591_s19 }
 0x170   : > { %s2593_s21 = scalar_lea.hbm %s2592_s19, 256  ;;  %p2598_p1 = scmp.lt.s32.totalorder %s2592_s19, %s4534_s3 }
 0x171   : > { %p2594_p12 = scmp.ne.s32.totalorder %s2592_s19, %s2593_s21  ;;  %p2599_p2 = scmp.lt.s32.totalorder %s2597_s27, %s2593_s21 }
 0x173   : > { %p2595_p13 = pnand %p2594_p12, %p2726_p4  ;;  %p2600_p3 = por %p2599_p2, %p2598_p1 }
 0x174   : > { %1100 = vrot.lane.b32.xlu2 %v2922_v38, %s2661_s8  ;;  %1098 = vrot.lane.b32.xlu1 %v2925_v39, %s2661_s8 }
 0x175   : > { %1096 = vrot.lane.b32.xlu0 %v2905_v33, %s2661_s8  ;;  %p2596_p0 = pneg %p2595_p13 }
 0x176   : > { %v3462_v34 = vpop.permute.xlu2 %970  ;;  %v3464_v20 = vpop.permute.xlu1 %886 }
 0x177   : > { %v3466_v15 = vpop.permute.xlu0 %884  ;;  %p2601_p5 = pnand %p2600_p3, %p2596_p0 }
 0x17c   : > { %1106 = vrot.lane.b32.xlu2 %v2939_v42, %s2661_s8  ;;  %1104 = vrot.lane.b32.xlu1 %v2942_v43, %s2661_s8 }
 0x17d   : > { %1102 = vrot.lane.b32.xlu0 %v2919_v37, %s2661_s8 }
 0x17e   : > { %v3474_v38 = vpop.permute.xlu2 %976  ;;  %v3476_v39 = vpop.permute.xlu1 %892 }
 0x17f   : > { %4677 = vst [vmem:[#allocation100_spill] sm:$0xff] %v3474_v38  ;;  %v3478_v33 = vpop.permute.xlu0 %890  ;;  %v2345_v38 = vld [vmem:[%s2746_s30 + $0x38] sm:$0xff] }
 0x184   : > { %1112 = vrot.lane.b32.xlu2 %v2956_v46, %s2661_s8  ;;  %1110 = vrot.lane.b32.xlu1 %v2959_v47, %s2661_s8 }
 0x185   : > { %1108 = vrot.lane.b32.xlu0 %v2936_v41, %s2661_s8 }
 0x186   : > { %v3486_v42 = vpop.permute.xlu2 %982  ;;  %v3488_v43 = vpop.permute.xlu1 %898 }
 0x187   : > { %4678 = vst [vmem:[#allocation101_spill] sm:$0xff] %v3486_v42  ;;  %v3490_v37 = vpop.permute.xlu0 %896 }
 0x188   : > { %4679 = vst [vmem:[#allocation102_spill] sm:$0xff] %v3490_v37 }
 0x18c   : > { %1118 = vrot.lane.b32.xlu2 %v2977_v52, %s2661_s8  ;;  %1116 = vrot.lane.b32.xlu1 %v2980_v53, %s2661_s8 }
 0x18d   : > { %1114 = vrot.lane.b32.xlu0 %v2953_v45, %s2661_s8 }
 0x18e   : > { %v3498_v46 = vpop.permute.xlu2 %988  ;;  %v3500_v47 = vpop.permute.xlu1 %968 }
 0x18f   : > { %4680 = vst [vmem:[#allocation103_spill] sm:$0xff] %v3498_v46  ;;  %v3502_v41 = vpop.permute.xlu0 %966 }
 0x190   : > { %4681 = vst [vmem:[#allocation104_spill] sm:$0xff] %v3502_v41  ;;  %v4697_v41 = vld [vmem:[#allocation35_spill] sm:$0xff] }
 0x194   : > { %1124 = vrot.lane.b32.xlu2 %v2998_v58, %s2661_s8  ;;  %1122 = vrot.lane.b32.xlu1 %v3001_v59, %s2661_s8 }
 0x195   : > { %1120 = vrot.lane.b32.xlu0 %v2974_v51, %s2661_s8 }
 0x196   : > { %v3510_v52 = vpop.permute.xlu2 %994  ;;  %v3512_v53 = vpop.permute.xlu1 %974 }
 0x197   : > { %v973_v45 = vpop.permute.xlu0 %972 }
 0x19c   : > { %1130 = vrot.lane.b32.xlu2 %v3019_v2, %s2661_s8  ;;  %1128 = vrot.lane.b32.xlu1 %v3022_v5, %s2661_s8  ;;  %v4687_v5 = vld [vmem:[#allocation28_spill] sm:$0xff] }
 0x19d   : > { %1126 = vrot.lane.b32.xlu0 %v2995_v57, %s2661_s8  ;;  %4690 = vst [vmem:[#allocation28_spill] sm:$0xff] %v3563_v23 }
 0x19e   : > { %v3520_v58 = vpop.permute.xlu2 %1000  ;;  %v3522_v59 = vpop.permute.xlu1 %980 }
 0x19f   : > { %4682 = vst [vmem:[#allocation105_spill] sm:$0xff] %v3522_v59  ;;  %v3524_v42 = vpop.permute.xlu0 %978  ;;  %v4703_v59 = vld [vmem:[#allocation73_spill] sm:$0xff] }
 0x1a0   : > { %4683 = vst [vmem:[#allocation106_spill] sm:$0xff] %v3524_v42  ;;  %v2344_v42 = vld [vmem:[%s2746_s30 + $0x30] sm:$0xff]  ;;  %v1599_v37 = vsel %vm1574_vm0, %v4703_v59, %v4702_v28 }
 0x1a4   : > { %1136 = vrot.lane.b32.xlu2 %v3040_v40, %s2661_s8  ;;  %1134 = vrot.lane.b32.xlu1 %v3043_v62, %s2661_s8 }
 0x1a5   : > { %1132 = vrot.lane.b32.xlu0 %v3016_v63, %s2661_s8 }
 0x1a6   : > { %v3532_v51 = vpop.permute.xlu2 %1006  ;;  %v3534_v2 = vpop.permute.xlu1 %986 }
 0x1a7   : > { %4684 = vst [vmem:[#allocation107_spill] sm:$0xff] %v3534_v2  ;;  %v3536_v57 = vpop.permute.xlu0 %984  ;;  %v4696_v2 = vld [vmem:[#allocation12_spill] sm:$0xff] }
 0x1a8   : > { %4685 = vst [vmem:[#allocation108_spill] sm:$0xff] %v3536_v57  ;;  %v1578_v11 = vsel %vm1574_vm0, %v4697_v41, %v4696_v2  ;;  %v4705_v2 = vld [vmem:[#allocation81_spill] sm:$0xff] }
 0x1ac   : > { %1142 = vrot.lane.b32.xlu2 %v3061_v36, %s2661_s8  ;;  %1140 = vrot.lane.b32.xlu1 %v3064_v56, %s2661_s8  ;;  %v4688_v36 = vld [vmem:[#allocation29_spill] sm:$0xff]  ;;  %v4689_v56 = vld [vmem:[#allocation23_spill] sm:$0xff] }
 0x1ad   : > { %1138 = vrot.lane.b32.xlu0 %v3037_v48, %s2661_s8  ;;  %4694 = vst [vmem:[#allocation23_spill] sm:$0xff] %v3580_v12 }
 0x1ae   : > { %v3544_v40 = vpop.permute.xlu2 %1012  ;;  %v3546_v62 = vpop.permute.xlu1 %992 }
 0x1af   : > { %v3548_v63 = vpop.permute.xlu0 %990 }
 0x1b0   : > { %4686 = vst [vmem:[#allocation109_spill] sm:$0xff] %v3548_v63  ;;  %v4691_v63 = vld [vmem:[#allocation33_spill] sm:$0xff] }
 0x1b4   : > { %1148 = vrot.lane.b32.xlu2 %v4687_v5, %s2661_s8  ;;  %1146 = vrot.lane.b32.xlu1 %v4688_v36, %s2661_s8  ;;  %v4692_v5 = vld [vmem:[#allocation27_spill] sm:$0xff] }
 0x1b5   : > { %1144 = vrot.lane.b32.xlu0 %v4689_v56, %s2661_s8 }
 0x1b6   : > { %v3556_v57 = vpop.permute.xlu2 %1018  ;;  %v3558_v48 = vpop.permute.xlu1 %998 }
 0x1b7   : > { %v3560_v46 = vpop.permute.xlu0 %996 }
 0x1bc   : > { %1154 = vrot.lane.b32.xlu2 %v3563_v23, %s2661_s8  ;;  %1152 = vrot.lane.b32.xlu1 %v4691_v63, %s2661_s8 }
 0x1bd   : > { %1150 = vrot.lane.b32.xlu0 %v4692_v5, %s2661_s8 }
 0x1be   : > { %v3571_v36 = vpop.permute.xlu2 %1024  ;;  %v3573_v56 = vpop.permute.xlu1 %1004 }
 0x1bf   : > { %4693 = vst [vmem:[#allocation29_spill] sm:$0xff] %v3571_v36  ;;  %v3575_v18 = vpop.permute.xlu0 %1002  ;;  %v4700_v36 = vld [vmem:[#allocation80_spill] sm:$0xff] }
 0x1c4   : > { %1224 = vrot.lane.b32.xlu2 %v2345_v38, %s2662_s9  ;;  %1222 = vrot.lane.b32.xlu1 %v2344_v42, %s2662_s9  ;;  %v1611_v38 = vsel %vm1607_vm1, %v1578_v11, %v4698_v10  ;;  %v4699_v42 = vld [vmem:[#allocation42_spill] sm:$0xff]  ;;  %v4704_v11 = vld [vmem:[#allocation39_spill] sm:$0xff] }
 0x1c5   : > { %1156 = vrot.lane.b32.xlu0 %v3580_v12, %s2661_s8  ;;  %v1600_v12 = vsel %vm1574_vm0, %v4700_v36, %v4699_v42  ;;  %v1644_v10 = vsel %vm1640_vm2, %v1611_v38, %v3374_v14 }
 0x1c6   : > { %v3586_v63 = vpop.permute.xlu2 %1094  ;;  %v3588_v5 = vpop.permute.xlu1 %1010  ;;  %v1633_v41 = vsel %vm1607_vm1, %v1600_v12, %v3340_v1  ;;  %v1677_v42 = vsel %vm1673_vm3, %v1644_v10, %v973_v45  ;;  %v4706_v45 = vld [vmem:[#allocation50_spill] sm:$0xff]  ;;  %v4708_v10 = vld [vmem:[#allocation79_spill] sm:$0xff] }
 0x1c7   : > { %4695 = vst [vmem:[#allocation33_spill] sm:$0xff] %v3586_v63  ;;  %v3590_v23 = vpop.permute.xlu0 %1008  ;;  %v4701_v63 = vld [vmem:[#allocation45_spill] sm:$0xff]  ;;  %v1666_v36 = vsel %vm1640_vm2, %v1633_v41, %v3420_v25  ;;  %v4707_v41 = vld [vmem:[#allocation48_spill] sm:$0xff] }
 0x1c8   : > { %v2351_v25 = vld [vmem:[%s2746_s30 + $0x80] sm:$0xff] }
 0x1cc   : > { %1230 = vrot.lane.b32.xlu2 %v2348_v17, %s2662_s9  ;;  %1228 = vrot.lane.b32.xlu1 %v4701_v63, %s2662_s9  ;;  %v1632_v17 = vsel %vm1607_vm1, %v1599_v37, %v4705_v2 }
 0x1cd   : > { %1226 = vrot.lane.b32.xlu0 %v4704_v11, %s2662_s9  ;;  %v1665_v1 = vsel %vm1640_vm2, %v1632_v17, %v3464_v20  ;;  %v1602_v20 = vsel %vm1574_vm0, %v4708_v10, %v4707_v41  ;;  %v4709_v11 = vld [vmem:[#allocation44_spill] sm:$0xff]  ;;  %v4713_v10 = vld [vmem:[#allocation49_spill] sm:$0xff] }
 0x1ce   : > { %v1101_v28 = vpop.permute.xlu2 %1100  ;;  %v1017_v59 = vpop.permute.xlu1 %1016  ;;  %v1635_v2 = vsel %vm1607_vm1, %v1602_v20, %v3294_v55  ;;  %v4712_v55 = vld [vmem:[#allocation56_spill] sm:$0xff] }
 0x1cf   : > { %v3621_v14 = vsel %vm1706_vm4, %v1677_v42, %v1101_v28  ;;  %v3624_v12 = vsel %vm1673_vm3, %v1666_v36, %v1017_v59  ;;  %v1015_v38 = vpop.permute.xlu0 %1014  ;;  %v1668_v42 = vsel %vm1640_vm2, %v1635_v2, %v3476_v39 }
 0x1d0   : > { %v3627_v37 = vsel %vm1673_vm3, %v1665_v1, %v1015_v38  ;;  %v2354_v1 = vld [vmem:[%s2746_s30 + $0xa8] sm:$0xff]  ;;  %v4711_v38 = vld [vmem:[#allocation52_spill] sm:$0xff] }
 0x1d4   : > { %1236 = vrot.lane.b32.xlu2 %v2351_v25, %s2662_s9  ;;  %1234 = vrot.lane.b32.xlu1 %v4706_v45, %s2662_s9  ;;  %v1606_v25 = vsel %vm1574_vm0, %v3305_v49, %v4711_v38  ;;  %v4717_v38 = vld [vmem:[#allocation58_spill] sm:$0xff] }
 0x1d5   : > { %1232 = vrot.lane.b32.xlu0 %v4709_v11, %s2662_s9  ;;  %v1639_v41 = vsel %vm1607_vm1, %v1606_v25, %v3364_v6 }
 0x1d6   : > { %v3640_v17 = vpop.permute.xlu2 %1106  ;;  %v3642_v36 = vpop.permute.xlu1 %1022  ;;  %v1672_v39 = vsel %vm1640_vm2, %v1639_v41, %v3450_v27  ;;  %v4718_v27 = vld [vmem:[#allocation62_spill] sm:$0xff] }
 0x1d7   : > { %4710 = vst [vmem:[#allocation27_spill] sm:$0xff] %v3640_v17  ;;  %v1021_v28 = vpop.permute.xlu0 %1020  ;;  %v2392_v17 = vld [vmem:[%s2746_s30 + $0xf1] sm:$0xff] }
 0x1d8   : > { %v3647_v59 = vsel %vm1673_vm3, %v1668_v42, %v1021_v28  ;;  %v2357_v42 = vld [vmem:[%s2746_s30 + $0xc8] sm:$0xff]  ;;  %v4715_v28 = vld [vmem:[#allocation9_spill] sm:$0xff] }
 0x1dc   : > { %1242 = vrot.lane.b32.xlu2 %v2354_v1, %s2662_s9  ;;  %1240 = vrot.lane.b32.xlu1 %v4712_v55, %s2662_s9  ;;  %v4716_v1 = vld [vmem:[#allocation34_spill] sm:$0xff] }
 0x1dd   : > { %1238 = vrot.lane.b32.xlu0 %v4713_v10, %s2662_s9  ;;  %v1577_v6 = vsel %vm1574_vm0, %v4716_v1, %v4715_v28  ;;  %v4719_v10 = vld [vmem:[#allocation55_spill] sm:$0xff] }
 0x1de   : > { %v3662_v20 = vpop.permute.xlu2 %1112  ;;  %v1029_v11 = vpop.permute.xlu1 %1028  ;;  %v1610_v25 = vsel %vm1607_vm1, %v1577_v6, %v4717_v38  ;;  %v4722_v38 = vld [vmem:[#allocation26_spill] sm:$0xff] }
 0x1df   : > { %4714 = vst [vmem:[#allocation12_spill] sm:$0xff] %v3662_v20  ;;  %v3665_v49 = vsel %vm1673_vm3, %v1672_v39, %v1029_v11  ;;  %v3667_v2 = vpop.permute.xlu0 %1026  ;;  %v1643_v41 = vsel %vm1640_vm2, %v1610_v25, %v3376_v9  ;;  %v1590_v20 = vsel %vm1574_vm0, %v4719_v10, %v4722_v38  ;;  %v4723_v9 = vld [vmem:[#allocation63_spill] sm:$0xff]  ;;  %v4728_v38 = vld [vmem:[#allocation32_spill] sm:$0xff] }
 0x1e0   : > { %v1676_v39 = vsel %vm1673_vm3, %v1643_v41, %v3462_v34  ;;  %v1623_v25 = vsel %vm1607_vm1, %v1590_v20, %v4723_v9  ;;  %v4724_v34 = vld [vmem:[#allocation68_spill] sm:$0xff]  ;;  %v4729_v9 = vld [vmem:[#allocation69_spill] sm:$0xff] }
 0x1e1   : > { %v1656_v41 = vsel %vm1640_vm2, %v1623_v25, %v3422_v21 }
 0x1e4   : > { %1248 = vrot.lane.b32.xlu2 %v2357_v42, %s2662_s9  ;;  %1246 = vrot.lane.b32.xlu1 %v4718_v27, %s2662_s9  ;;  %v2360_v42 = vld [vmem:[%s2746_s30 + $0xf0] sm:$0xff] }
 0x1e5   : > { %1244 = vrot.lane.b32.xlu0 %v4719_v10, %s2662_s9 }
 0x1e6   : > { %v3684_v11 = vpop.permute.xlu2 %1118  ;;  %v1099_v28 = vpop.permute.xlu1 %1098 }
 0x1e7   : > { %4720 = vst [vmem:[#allocation35_spill] sm:$0xff] %v3684_v11  ;;  %v3687_v1 = vsel %vm1706_vm4, %v1676_v39, %v1099_v28  ;;  %v3689_v6 = vpop.permute.xlu0 %1096  ;;  %v4725_v39 = vld [vmem:[#allocation61_spill] sm:$0xff]  ;;  %v1689_v28 = vsel %vm1673_vm3, %v1656_v41, %v3560_v46  ;;  %v4730_v46 = vld [vmem:[#allocation74_spill] sm:$0xff] }
 0x1e8   : > { %4721 = vst [vmem:[#allocation41_spill] sm:$0xff] %v3687_v1  ;;  %v1593_v21 = vsel %vm1574_vm0, %v4725_v39, %v4728_v38  ;;  %v4735_v1 = vld [vmem:[#allocation75_spill] sm:$0xff] }
 0x1e9   : > { %v1626_v25 = vsel %vm1607_vm1, %v1593_v21, %v4729_v9  ;;  %v2424_v9 = vld [vmem:[%s2746_s30 + $0xf2] sm:$0xff] }
 0x1ea   : > { %v1659_v41 = vsel %vm1640_vm2, %v1626_v25, %v3434_v29  ;;  %v4734_v29 = vld [vmem:[#allocation38_spill] sm:$0xff] }
 0x1ec   : > { %1254 = vrot.lane.b32.xlu2 %v2360_v42, %s2662_s9  ;;  %1252 = vrot.lane.b32.xlu1 %v4724_v34, %s2662_s9 }
 0x1ed   : > { %1250 = vrot.lane.b32.xlu0 %v4725_v39, %s2662_s9 }
 0x1ee   : > { %v1125_v11 = vpop.permute.xlu2 %1124  ;;  %v3706_v10 = vpop.permute.xlu1 %1104 }
 0x1ef   : > { %4726 = vst [vmem:[#allocation42_spill] sm:$0xff] %v3706_v10  ;;  %v3709_v20 = vsel %vm1706_vm4, %v1689_v28, %v1125_v11  ;;  %v3711_v42 = vpop.permute.xlu0 %1102  ;;  %v4731_v11 = vld [vmem:[#allocation67_spill] sm:$0xff]  ;;  %v1692_v28 = vsel %vm1673_vm3, %v1659_v41, %v3575_v18 }
 0x1f0   : > { %4727 = vst [vmem:[#allocation80_spill] sm:$0xff] %v3709_v20  ;;  %v2400_v10 = vld [vmem:[%s2746_s30 + $0x151] sm:$0xff]  ;;  %v1596_v25 = vsel %vm1574_vm0, %v4731_v11, %v4734_v29 }
 0x1f1   : > { %v1629_v18 = vsel %vm1607_vm1, %v1596_v25, %v4735_v1  ;;  %v2376_v29 = vld [vmem:[%s2746_s30 + $0x31] sm:$0xff] }
 0x1f2   : > { %v2432_v25 = vld [vmem:[%s2746_s30 + $0x152] sm:$0xff] }
 0x1f4   : > { %1270 = vrot.lane.b32.xlu2 %v3286_v30, %s2662_s9  ;;  %1258 = vrot.lane.b32.xlu1 %v4730_v46, %s2662_s9 }
 0x1f5   : > { %1256 = vrot.lane.b32.xlu0 %v4731_v11, %s2662_s9 }
 0x1f6   : > { %v1131_v20 = vpop.permute.xlu2 %1130  ;;  %v3728_v39 = vpop.permute.xlu1 %1110 }
 0x1f7   : > { %4732 = vst [vmem:[#allocation45_spill] sm:$0xff] %v3728_v39  ;;  %v3731_v38 = vsel %vm1706_vm4, %v1692_v28, %v1131_v20  ;;  %v3733_v21 = vpop.permute.xlu0 %1108  ;;  %v1662_v20 = vsel %vm1640_vm2, %v1629_v18, %v3452_v31  ;;  %v4737_v39 = vld [vmem:[#allocation54_spill] sm:$0xff]  ;;  %v4738_v18 = vld [vmem:[#allocation21_spill] sm:$0xff] }
 0x1f8   : > { %4733 = vst [vmem:[#allocation43_spill] sm:$0xff] %v3731_v38  ;;  %v1695_v41 = vsel %vm1673_vm3, %v1662_v20, %v3590_v23  ;;  %v4739_v23 = vld [vmem:[#allocation82_spill] sm:$0xff] }
 0x1fc   : > { %1510 = vrot.lane.b32.xlu2 %v2424_v9, %s2663_s10  ;;  %1398 = vrot.lane.b32.xlu1 %v2400_v10, %s2664_s11  ;;  %v2384_v9 = vld [vmem:[%s2746_s30 + $0x91] sm:$0xff] }
 0x1fd   : > { %1382 = vrot.lane.b32.xlu0 %v2392_v17, %s2664_s11  ;;  %v4736_v10 = vld [vmem:[#allocation11_spill] sm:$0xff]  ;;  %v1588_v17 = vsel %vm1574_vm0, %v4712_v55, %v4738_v18 }
 0x1fe   : > { %v1137_v28 = vpop.permute.xlu2 %1136  ;;  %v3750_v38 = vpop.permute.xlu1 %1116  ;;  %v1589_v31 = vsel %vm1574_vm0, %v4737_v39, %v4736_v10 }
 0x1ff   : > { %v3753_v11 = vsel %vm1706_vm4, %v1695_v41, %v1137_v28  ;;  %v3755_v1 = vpop.permute.xlu0 %1114  ;;  %v1622_v20 = vsel %vm1607_vm1, %v1589_v31, %v4739_v23  ;;  %v4740_v41 = vld [vmem:[#allocation83_spill] sm:$0xff] }
 0x200   : > { %v1621_v28 = vsel %vm1607_vm1, %v1588_v17, %v4740_v41  ;;  %v1655_v39 = vsel %vm1640_vm2, %v1622_v20, %v3424_v26  ;;  %v2408_v23 = vld [vmem:[%s2746_s30 + $0x32] sm:$0xff] }
 0x201   : > { %v1654_v55 = vsel %vm1640_vm2, %v1621_v28, %v3372_v13  ;;  %v1688_v10 = vsel %vm1673_vm3, %v1655_v39, %v3510_v52  ;;  %v2416_v13 = vld [vmem:[%s2746_s30 + $0x92] sm:$0xff]  ;;  %v4741_v52 = vld [vmem:[#allocation14_spill] sm:$0xff]  ;;  %v4743_v39 = vld [vmem:[#allocation25_spill] sm:$0xff] }
 0x202   : > { %v2369_v20 = vld [vmem:[%s2746_s30 + $0x158] sm:$0xff] }
 0x203   : > { %v4742_v41 = vld [vmem:[#allocation60_spill] sm:$0xff] }
 0x204   : > { %1366 = vrot.lane.b32.xlu2 %v2384_v9, %s2664_s11  ;;  %1350 = vrot.lane.b32.xlu1 %v2376_v29, %s2664_s11  ;;  %v1687_v9 = vsel %vm1673_vm3, %v1654_v55, %v3546_v62  ;;  %v1592_v28 = vsel %vm1574_vm0, %v4742_v41, %v4741_v52  ;;  %v1591_v62 = vsel %vm1574_vm0, %v4718_v27, %v4743_v39  ;;  %v2393_v39 = vld [vmem:[%s2746_s30 + $0xf9] sm:$0xff] }
 0x205   : > { %1526 = vrot.lane.b32.xlu0 %v2432_v25, %s2663_s10 }
 0x206   : > { %v1143_v31 = vpop.permute.xlu2 %1142  ;;  %v1123_v18 = vpop.permute.xlu1 %1122 }
 0x207   : > { %v3783_v29 = vsel %vm1706_vm4, %v3627_v37, %v1143_v31  ;;  %v3786_v17 = vsel %vm1706_vm4, %v1688_v10, %v1123_v18  ;;  %v1121_v26 = vpop.permute.xlu0 %1120  ;;  %v4744_v37 = vld [vmem:[#allocation86_spill] sm:$0xff]  ;;  %v4745_v10 = vld [vmem:[#allocation87_spill] sm:$0xff] }
 0x208   : > { %v3789_v25 = vsel %vm1706_vm4, %v1687_v9, %v1121_v26  ;;  %v1625_v55 = vsel %vm1607_vm1, %v1592_v28, %v4744_v37  ;;  %v1624_v31 = vsel %vm1607_vm1, %v1591_v62, %v4745_v10  ;;  %v2401_v28 = vld [vmem:[%s2746_s30 + $0x159] sm:$0xff]  ;;  %v4747_v62 = vld [vmem:[#allocation66_spill] sm:$0xff]  ;;  %v4750_v10 = vld [vmem:[#allocation31_spill] sm:$0xff] }
 0x209   : > { %v1658_v18 = vsel %vm1640_vm2, %v1625_v55, %v3436_v24  ;;  %v1657_v27 = vsel %vm1640_vm2, %v1624_v31, %v3384_v16  ;;  %v2425_v16 = vld [vmem:[%s2746_s30 + $0xfa] sm:$0xff]  ;;  %v1594_v31 = vsel %vm1574_vm0, %v4724_v34, %v4750_v10 }
 0x20a   : > { %v1691_v9 = vsel %vm1673_vm3, %v1658_v18, %v3520_v58  ;;  %v4746_v58 = vld [vmem:[#allocation17_spill] sm:$0xff] }
 0x20b   : > { %v1595_v37 = vsel %vm1574_vm0, %v4747_v62, %v4746_v58  ;;  %v4748_v55 = vld [vmem:[#allocation53_spill] sm:$0xff] }
 0x20c   : > { %1494 = vrot.lane.b32.xlu2 %v2416_v13, %s2663_s10  ;;  %1478 = vrot.lane.b32.xlu1 %v2408_v23, %s2663_s10  ;;  %v1690_v13 = vsel %vm1673_vm3, %v1657_v27, %v3558_v48  ;;  %v4749_v48 = vld [vmem:[#allocation85_spill] sm:$0xff]  ;;  %v1628_v27 = vsel %vm1607_vm1, %v1595_v37, %v3314_v35  ;;  %v4752_v37 = vld [vmem:[#allocation20_spill] sm:$0xff] }
 0x20d   : > { %1272 = vrot.lane.b32.xlu0 %v2369_v20, %s2662_s9  ;;  %v4751_v58 = vld [vmem:[#allocation13_spill] sm:$0xff] }
 0x20e   : > { %v1149_v26 = vpop.permute.xlu2 %1148  ;;  %v1129_v52 = vpop.permute.xlu1 %1128  ;;  %v2433_v62 = vld [vmem:[%s2746_s30 + $0x15a] sm:$0xff] }
 0x20f   : > { %v3817_v23 = vsel %vm1706_vm4, %v3647_v59, %v1149_v26  ;;  %v3820_v41 = vsel %vm1706_vm4, %v1691_v9, %v1129_v52  ;;  %v1127_v24 = vpop.permute.xlu0 %1126  ;;  %v1605_v59 = vsel %vm1574_vm0, %v4749_v48, %v4748_v55  ;;  %v1627_v9 = vsel %vm1607_vm1, %v1594_v31, %v3316_v54  ;;  %v4753_v55 = vld [vmem:[#allocation72_spill] sm:$0xff]  ;;  %v4755_v31 = vld [vmem:[#allocation37_spill] sm:$0xff] }
 0x210   : > { %v3823_v20 = vsel %vm1706_vm4, %v1690_v13, %v1127_v24  ;;  %v1638_v18 = vsel %vm1607_vm1, %v1605_v59, %v3312_v60  ;;  %v1661_v26 = vsel %vm1640_vm2, %v1628_v27, %v3454_v32  ;;  %v1660_v60 = vsel %vm1640_vm2, %v1627_v9, %v3396_v19  ;;  %v257_v24 = vld [vmem:[%s2746_s30 + $0x8] sm:$0xff]  ;;  %v4754_v59 = vld [vmem:[#allocation59_spill] sm:$0xff] }
 0x211   : > { %v1671_v34 = vsel %vm1640_vm2, %v1638_v18, %v3488_v43  ;;  %v1694_v35 = vsel %vm1673_vm3, %v1661_v26, %v3532_v51  ;;  %v1693_v32 = vsel %vm1673_vm3, %v1660_v60, %v3573_v56  ;;  %v2385_v51 = vld [vmem:[%s2746_s30 + $0x99] sm:$0xff]  ;;  %v1598_v56 = vsel %vm1574_vm0, %v4753_v55, %v4752_v37 }
 0x212   : > { %v1704_v52 = vsel %vm1673_vm3, %v1671_v34, %v3667_v2  ;;  %v1576_v2 = vsel %vm1574_vm0, %v257_v24, %v4751_v58  ;;  %v1597_v18 = vsel %vm1574_vm0, %v4730_v46, %v4755_v31  ;;  %v1631_v9 = vsel %vm1607_vm1, %v1598_v56, %v3326_v50  ;;  %v4756_v24 = vld [vmem:[#allocation5_spill] sm:$0xff] }
 0x213   : > { %v1609_v10 = vsel %vm1607_vm1, %v1576_v2, %v4754_v59  ;;  %v1630_v26 = vsel %vm1607_vm1, %v1597_v18, %v3328_v61  ;;  %v1664_v34 = vsel %vm1640_vm2, %v1631_v9, %v3466_v15  ;;  %v2402_v18 = vld [vmem:[%s2746_s30 + $0x169] sm:$0xff] }
 0x214   : > { %1512 = vrot.lane.b32.xlu2 %v2425_v16, %s2663_s10  ;;  %1400 = vrot.lane.b32.xlu1 %v2401_v28, %s2664_s11  ;;  %v1642_v27 = vsel %vm1640_vm2, %v1609_v10, %v3324_v44  ;;  %v1663_v50 = vsel %vm1640_vm2, %v1630_v26, %v3408_v22  ;;  %v1697_v44 = vsel %vm1673_vm3, %v1664_v34, %v3544_v40  ;;  %v2409_v40 = vld [vmem:[%s2746_s30 + $0x3a] sm:$0xff]  ;;  %v4762_v9 = vld [vmem:[#allocation30_spill] sm:$0xff] }
 0x215   : > { %1384 = vrot.lane.b32.xlu0 %v2393_v39, %s2664_s11  ;;  %v2377_v39 = vld [vmem:[%s2746_s30 + $0x39] sm:$0xff]  ;;  %v1675_v46 = vsel %vm1673_vm3, %v1642_v27, %v3500_v47  ;;  %v1696_v61 = vsel %vm1673_vm3, %v1663_v50, %v3588_v5  ;;  %v4761_v27 = vld [vmem:[#allocation15_spill] sm:$0xff] }
 0x216   : > { %v1155_v54 = vpop.permute.xlu2 %1154  ;;  %v1135_v13 = vpop.permute.xlu1 %1134  ;;  %v1708_v60 = vsel %vm1706_vm4, %v1675_v46, %v3689_v6  ;;  %v4763_v26 = vld [vmem:[#allocation84_spill] sm:$0xff]  ;;  %v4764_v46 = vld [vmem:[#allocation71_spill] sm:$0xff] }
 0x217   : > { %v3860_v43 = vsel %vm1706_vm4, %v1704_v52, %v1155_v54  ;;  %v3863_v16 = vsel %vm1706_vm4, %v1694_v35, %v1135_v13  ;;  %v1133_v28 = vpop.permute.xlu0 %1132  ;;  %v2417_v13 = vld [vmem:[%s2746_s30 + $0x9a] sm:$0xff]  ;;  %v1604_v34 = vsel %vm1574_vm0, %v4763_v26, %v4762_v9  ;;  %v4777_v9 = vld [vmem:[#allocation107_spill] sm:$0xff] }
 0x218   : > { %v3866_v19 = vsel %vm1706_vm4, %v1693_v32, %v1133_v28  ;;  %v4757_v32 = vld [vmem:[#allocation40_spill] sm:$0xff] }
 0x219   : > { %v1579_v6 = vsel %vm1574_vm0, %v4757_v32, %v4756_v24  ;;  %v4758_v28 = vld [vmem:[#allocation24_spill] sm:$0xff] }
 0x21c   : > { %1368 = vrot.lane.b32.xlu2 %v2385_v51, %s2664_s11  ;;  %1352 = vrot.lane.b32.xlu1 %v2377_v39, %s2664_s11  ;;  %v4759_v51 = vld [vmem:[#allocation78_spill] sm:$0xff]  ;;  %v4760_v39 = vld [vmem:[#allocation65_spill] sm:$0xff] }
 0x21d   : > { %1528 = vrot.lane.b32.xlu0 %v2433_v62, %s2663_s10  ;;  %v1601_v5 = vsel %vm1574_vm0, %v4759_v51, %v4758_v28  ;;  %v1612_v58 = vsel %vm1607_vm1, %v1579_v6, %v4760_v39  ;;  %v256_v6 = vld [vmem:[%s2746_s30] sm:$0xff] }
 0x21e   : > { %v1225_v35 = vpop.permute.xlu2 %1224  ;;  %v1141_v52 = vpop.permute.xlu1 %1140  ;;  %v1645_v2 = vsel %vm1640_vm2, %v1612_v58, %v3336_v0  ;;  %v1634_v62 = vsel %vm1607_vm1, %v1601_v5, %v3338_v4 }
 0x21f   : > { %v3903_v15 = vsel %vm1739_vm5, %v1708_v60, %v1225_v35  ;;  %v3906_v47 = vsel %vm1706_vm4, %v1697_v44, %v1141_v52  ;;  %v1139_v54 = vpop.permute.xlu0 %1138  ;;  %v1667_v37 = vsel %vm1640_vm2, %v1634_v62, %v3478_v33  ;;  %v1678_v55 = vsel %vm1673_vm3, %v1645_v2, %v3512_v53  ;;  %v4765_v44 = vld [vmem:[#allocation47_spill] sm:$0xff]  ;;  %v4766_v52 = vld [vmem:[#allocation102_spill] sm:$0xff] }
 0x220   : > { %v3909_v22 = vsel %vm1706_vm4, %v1696_v61, %v1139_v54  ;;  %v1700_v0 = vsel %vm1673_vm3, %v1667_v37, %v3556_v57  ;;  %v1711_v4 = vsel %vm1706_vm4, %v1678_v55, %v3711_v42  ;;  %v1582_v57 = vsel %vm1574_vm0, %v4701_v63, %v4761_v27  ;;  %v2394_v42 = vld [vmem:[%s2746_s30 + $0x109] sm:$0xff]  ;;  %v4767_v54 = vld [vmem:[#allocation105_spill] sm:$0xff] }
 0x221   : > { %v1615_v50 = vsel %vm1607_vm1, %v1582_v57, %v4764_v46  ;;  %v1637_v35 = vsel %vm1607_vm1, %v1604_v34, %v3350_v8  ;;  %v2386_v2 = vld [vmem:[%s2746_s30 + $0xa9] sm:$0xff]  ;;  %v4778_v34 = vld [vmem:[#allocation33_spill] sm:$0xff] }
 0x222   : > { %v1648_v60 = vsel %vm1640_vm2, %v1615_v50, %v3348_v7  ;;  %v1670_v61 = vsel %vm1640_vm2, %v1637_v35, %v4766_v52  ;;  %v4768_v7 = vld [vmem:[#allocation97_spill] sm:$0xff]  ;;  %v2378_v62 = vld [vmem:[%s2746_s30 + $0x49] sm:$0xff] }
 0x223   : > { %v4770_v37 = vld [vmem:[#allocation10_spill] sm:$0xff]  ;;  %v1846_v52 = vld [vmem:[%s4532_s1 + $0x40] sm:$0xff] }
 0x224   : > { %1496 = vrot.lane.b32.xlu2 %v2417_v13, %s2663_s10  ;;  %1480 = vrot.lane.b32.xlu1 %v2409_v40, %s2663_s10  ;;  %v4769_v13 = vld [vmem:[#allocation29_spill] sm:$0xff]  ;;  %v4771_v55 = vld [vmem:[#allocation18_spill] sm:$0xff] }
 0x225   : > { %1274 = vrot.lane.b32.xlu0 %v4749_v48, %s2662_s9  ;;  %v2426_v48 = vld [vmem:[%s2746_s30 + $0x10a] sm:$0xff]  ;;  %v1703_v40 = vsel %vm1673_vm3, %v1670_v61, %v4769_v13  ;;  %2478 = vmatpush.msra.mxu1 %v1846_v52 }
 0x226   : > { %v1231_v56 = vpop.permute.xlu2 %1230  ;;  %v1147_v59 = vpop.permute.xlu1 %1146  ;;  %v4775_v27 = vld [vmem:[#allocation90_spill] sm:$0xff]  ;;  %2479 = vmatpush.msra.mxu2 %v1846_v52  ;;  %2480 = vmatpush.msra.mxu3 %v1846_v52 }
 0x227   : > { %v3938_v10 = vsel %vm1739_vm5, %v1711_v4, %v1231_v56  ;;  %v3941_v31 = vsel %vm1706_vm4, %v1700_v0, %v1147_v59  ;;  %v1145_v33 = vpop.permute.xlu0 %1144  ;;  %v1585_v0 = vsel %vm1574_vm0, %v4706_v45, %v4771_v55  ;;  %v4772_v4 = vld [vmem:[#allocation36_spill] sm:$0xff]  ;;  %v4773_v59 = vld [vmem:[#allocation77_spill] sm:$0xff]  ;;  %1955 = vmatpush.msra.mxu0 %v1846_v52  ;;  %v2418_v55 = vld [vmem:[%s2746_s30 + $0xaa] sm:$0xff] }
 0x228   : > { %v3945_v53 = vsel %vm1706_vm4, %v3624_v12, %v1145_v33  ;;  %v1603_v12 = vsel %vm1574_vm0, %v3286_v30, %v4765_v44  ;;  %v1681_v30 = vsel %vm1673_vm3, %v1648_v60, %v4767_v54  ;;  %v1618_v33 = vsel %vm1607_vm1, %v1585_v0, %v4773_v59  ;;  %v2410_v54 = vld [vmem:[%s2746_s30 + $0x4a] sm:$0xff] }
 0x229   : > { %v1636_v63 = vsel %vm1607_vm1, %v1603_v12, %v3352_v3  ;;  %v1714_v24 = vsel %vm1706_vm4, %v1681_v30, %v3733_v21  ;;  %v1575_v21 = vsel %vm1574_vm0, %v256_v6, %v4770_v37  ;;  %v2371_v30 = vld [vmem:[%s2746_s30 + $0x170] sm:$0xff]  ;;  %v1842_v6 = vld [vmem:[%s4532_s1 + $0x20] sm:$0xff]  ;;  %v4780_v37 = vld [vmem:[#allocation16_spill] sm:$0xff] }
 0x22a   : > { %v1669_v8 = vsel %vm1640_vm2, %v1636_v63, %v4768_v7  ;;  %v1608_v56 = vsel %vm1607_vm1, %v1575_v21, %v4772_v4  ;;  %v2363_v7 = vld [vmem:[%s2746_s30 + $0x110] sm:$0xff]  ;;  %v4781_v4 = vld [vmem:[#allocation6_spill] sm:$0xff] }
 0x22b   : > { %v1702_v28 = vsel %vm1673_vm3, %v1669_v8, %v3642_v36  ;;  %v2434_v36 = vld [vmem:[%s2746_s30 + $0x16a] sm:$0xff]  ;;  %v1641_v57 = vsel %vm1640_vm2, %v1608_v56, %v4775_v27 }
 0x22c   : > { %1514 = vrot.lane.b32.xlu2 %v2426_v48, %s2663_s10  ;;  %1402 = vrot.lane.b32.xlu1 %v2402_v18, %s2664_s11  ;;  %v4774_v48 = vld [vmem:[#allocation89_spill] sm:$0xff]  ;;  %v1844_v8 = vld [vmem:[%s4532_s1 + $0x30] sm:$0xff]  ;;  %v4782_v59 = vld [vmem:[#allocation46_spill] sm:$0xff] }
 0x22d   : > { %1386 = vrot.lane.b32.xlu0 %v2394_v42, %s2664_s11  ;;  %v1651_v18 = vsel %vm1640_vm2, %v1618_v33, %v4774_v48  ;;  %v4776_v42 = vld [vmem:[#allocation104_spill] sm:$0xff]  ;;  %v1840_v0 = vld [vmem:[%s4532_s1 + $0x10] sm:$0xff] }
 0x22e   : > { %v1237_v3 = vpop.permute.xlu2 %1236  ;;  %v1153_v32 = vpop.permute.xlu1 %1152  ;;  %v1674_v45 = vsel %vm1673_vm3, %v1641_v57, %v4776_v42  ;;  %v1684_v26 = vsel %vm1673_vm3, %v1651_v18, %v4777_v9  ;;  %v4783_v48 = vld [vmem:[#allocation64_spill] sm:$0xff]  ;;  %v4784_v27 = vld [vmem:[#allocation91_spill] sm:$0xff]  ;;  %v4786_v9 = vld [vmem:[#allocation106_spill] sm:$0xff] }
 0x22f   : > { %v3984_v51 = vsel %vm1739_vm5, %v1714_v24, %v1237_v3  ;;  %v3987_v5 = vsel %vm1706_vm4, %v1703_v40, %v1153_v32  ;;  %v1151_v39 = vpop.permute.xlu0 %1150  ;;  %v1707_v46 = vsel %vm1706_vm4, %v1674_v45, %v4778_v34  ;;  %v1717_v50 = vsel %vm1706_vm4, %v1684_v26, %v3755_v1  ;;  %v1845_v1 = vld [vmem:[%s4532_s1 + $0x38] sm:$0xff]  ;;  %v1839_v34 = vld [vmem:[%s4532_s1 + $0x8] sm:$0xff] }
 0x230   : > { %v3990_v58 = vsel %vm1706_vm4, %v1702_v28, %v1151_v39  ;;  %2481 = vmatpush.msra.mxu1 %v1845_v1  ;;  %2482 = vmatpush.msra.mxu2 %v1845_v1  ;;  %v4779_v28 = vld [vmem:[#allocation41_spill] sm:$0xff]  ;;  %v4785_v42 = vld [vmem:[#allocation92_spill] sm:$0xff] }
 0x231   : > { %2483 = vmatpush.msra.mxu3 %v1845_v1  ;;  %1956 = vmatpush.msra.mxu0 %v1845_v1  ;;  %v4789_v1 = vld [vmem:[#allocation42_spill] sm:$0xff] }
 0x232   : > { %2484 = vmatpush.msra.mxu1 %v1844_v8  ;;  %2485 = vmatpush.msra.mxu2 %v1844_v8 }
 0x233   : > { %2486 = vmatpush.msra.mxu3 %v1844_v8  ;;  %1957 = vmatpush.msra.mxu0 %v1844_v8  ;;  %v1838_v8 = vld [vmem:[%s4532_s1] sm:$0xff] }
 0x234   : > { %1370 = vrot.lane.b32.xlu2 %v2386_v2, %s2664_s11  ;;  %1354 = vrot.lane.b32.xlu1 %v2378_v62, %s2664_s11  ;;  %v2395_v2 = vld [vmem:[%s2746_s30 + $0x111] sm:$0xff]  ;;  %v2571_v62 = vld [vmem:[%s2746_s30 + $0x48] sm:$0xff] }
 0x235   : > { %1530 = vrot.lane.b32.xlu0 %v2434_v36, %s2663_s10  ;;  %v1581_v21 = vsel %vm1574_vm0, %v2571_v62, %v4780_v37  ;;  %v2572_v36 = vld [vmem:[%s2746_s30 + $0x38] sm:$0xff]  ;;  %v4790_v62 = vld [vmem:[#allocation22_spill] sm:$0xff] }
 0x236   : > { %v1243_v44 = vpop.permute.xlu2 %1242  ;;  %v1223_v12 = vpop.permute.xlu1 %1222  ;;  %v1580_v56 = vsel %vm1574_vm0, %v2572_v36, %v4781_v4  ;;  %v1614_v33 = vsel %vm1607_vm1, %v1581_v21, %v4782_v59  ;;  %v2387_v21 = vld [vmem:[%s2746_s30 + $0xb1] sm:$0xff]  ;;  %v4792_v4 = vld [vmem:[#allocation57_spill] sm:$0xff] }
 0x237   : > { %v4020_v60 = vsel %vm1739_vm5, %v1717_v50, %v1243_v44  ;;  %v4023_v35 = vsel %vm1739_vm5, %v1707_v46, %v1223_v12  ;;  %v1157_v63 = vpop.permute.xlu0 %1156  ;;  %v1613_v18 = vsel %vm1607_vm1, %v1580_v56, %v4783_v48  ;;  %v1647_v57 = vsel %vm1640_vm2, %v1614_v33, %v4784_v27  ;;  %v4787_v46 = vld [vmem:[#allocation100_spill] sm:$0xff]  ;;  %v4788_v44 = vld [vmem:[#allocation27_spill] sm:$0xff] }
 0x238   : > { %v4030_v61 = vsel %vm1706_vm4, %v3665_v49, %v1157_v63  ;;  %v1843_v49 = vld [vmem:[%s4532_s1 + $0x28] sm:$0xff]  ;;  %v1646_v45 = vsel %vm1640_vm2, %v1613_v18, %v4785_v42  ;;  %v1680_v26 = vsel %vm1673_vm3, %v1647_v57, %v4786_v9  ;;  %v4793_v59 = vld [vmem:[#allocation76_spill] sm:$0xff]  ;;  %v4794_v48 = vld [vmem:[#allocation95_spill] sm:$0xff] }
 0x239   : > { %2487 = vmatpush.msra.mxu1 %v1843_v49  ;;  %2488 = vmatpush.msra.mxu2 %v1843_v49  ;;  %v1679_v50 = vsel %vm1673_vm3, %v1646_v45, %v4787_v46  ;;  %v1713_v12 = vsel %vm1706_vm4, %v1680_v26, %v4788_v44  ;;  %v4795_v27 = vld [vmem:[#allocation88_spill] sm:$0xff]  ;;  %v4797_v45 = vld [vmem:[#allocation109_spill] sm:$0xff]  ;;  %v4798_v26 = vld [vmem:[#allocation103_spill] sm:$0xff] }
 0x23a   : > { %2489 = vmatpush.msra.mxu3 %v1843_v49  ;;  %1958 = vmatpush.msra.mxu0 %v1843_v49  ;;  %v4796_v57 = vld [vmem:[#allocation96_spill] sm:$0xff]  ;;  %v4799_v46 = vld [vmem:[#allocation35_spill] sm:$0xff] }
 0x23b   : > { %2490 = vmatpush.msra.mxu1 %v1842_v6  ;;  %2491 = vmatpush.msra.mxu2 %v1842_v6 }
 0x23c   : > { %1482 = vrot.lane.b32.xlu2 %v2410_v54, %s2663_s10  ;;  %1276 = vrot.lane.b32.xlu1 %v2371_v30, %s2662_s9  ;;  %v1712_v54 = vsel %vm1706_vm4, %v1679_v50, %v4789_v1 }
 0x23d   : > { %1260 = vrot.lane.b32.xlu0 %v2363_v7, %s2662_s9  ;;  %2492 = vmatpush.msra.mxu3 %v1842_v6 }
 0x23e   : > { %v1249_v13 = vpop.permute.xlu2 %1248  ;;  %v1229_v40 = vpop.permute.xlu1 %1228  ;;  %1959 = vmatpush.msra.mxu0 %v1842_v6 }
 0x23f   : > { %v4049_v24 = vsel %vm1739_vm5, %v3789_v25, %v1249_v13  ;;  %v4053_v3 = vsel %vm1739_vm5, %v3621_v14, %v1229_v40  ;;  %v1227_v32 = vpop.permute.xlu0 %1226  ;;  %v1841_v25 = vld [vmem:[%s4532_s1 + $0x18] sm:$0xff] }
 0x240   : > { %v4060_v39 = vsel %vm1739_vm5, %v4779_v28, %v1227_v32  ;;  %v2403_v14 = vld [vmem:[%s2746_s30 + $0x171] sm:$0xff]  ;;  %2493 = vmatpush.msra.mxu1 %v1841_v25  ;;  %2494 = vmatpush.msra.mxu2 %v1841_v25 }
 0x241   : > { %2495 = vmatpush.msra.mxu3 %v1841_v25  ;;  %1960 = vmatpush.msra.mxu0 %v1841_v25  ;;  %v2379_v13 = vld [vmem:[%s2746_s30 + $0x51] sm:$0xff] }
 0x242   : > { %2496 = vmatpush.msra.mxu1 %v1840_v0  ;;  %2497 = vmatpush.msra.mxu2 %v1840_v0  ;;  %v2435_v40 = vld [vmem:[%s2746_s30 + $0x172] sm:$0xff] }
 0x243   : > { %2498 = vmatpush.msra.mxu3 %v1840_v0  ;;  %1961 = vmatpush.msra.mxu0 %v1840_v0  ;;  %v2427_v32 = vld [vmem:[%s2746_s30 + $0x112] sm:$0xff] }
 0x244   : > { %1404 = vrot.lane.b32.xlu2 %v2403_v14, %s2664_s11  ;;  %1388 = vrot.lane.b32.xlu1 %v2395_v2, %s2664_s11  ;;  %v2364_v14 = vld [vmem:[%s2746_s30 + $0x120] sm:$0xff]  ;;  %v2573_v2 = vld [vmem:[%s2746_s30 + $0x90] sm:$0xff]  ;;  %v4791_v0 = vld [vmem:[#allocation8_spill] sm:$0xff] }
 0x245   : > { %1498 = vrot.lane.b32.xlu0 %v2418_v55, %s2663_s10  ;;  %2499 = vmatpush.msra.mxu1 %v1839_v34  ;;  %v1587_v37 = vsel %vm1574_vm0, %v2573_v2, %v4790_v62  ;;  %v2574_v55 = vld [vmem:[%s2746_s30 + $0x80] sm:$0xff] }
 0x246   : > { %v4097_v63 = vpop.permute.xlu2 %1254  ;;  %v1235_v52 = vpop.permute.xlu1 %1234  ;;  %2500 = vmatpush.msra.mxu2 %v1839_v34  ;;  %2501 = vmatpush.msra.mxu3 %v1839_v34  ;;  %v1586_v36 = vsel %vm1574_vm0, %v2574_v55, %v4791_v0  ;;  %v1620_v56 = vsel %vm1607_vm1, %v1587_v37, %v4792_v4  ;;  %v2575_v37 = vld [vmem:[%s2746_s30 + $0x60] sm:$0xff] }
 0x247   : > { %v4102_v30 = vsel %vm1739_vm5, %v1713_v12, %v1235_v52  ;;  %v1233_v7 = vpop.permute.xlu0 %1232  ;;  %2502 = vmatpush.msra.mxu1 %v1838_v8  ;;  %1962 = vmatpush.msra.mxu0 %v1839_v34  ;;  %v1619_v33 = vsel %vm1607_vm1, %v1586_v36, %v4793_v59  ;;  %v1653_v18 = vsel %vm1640_vm2, %v1620_v56, %v4794_v48  ;;  %v4802_v36 = vld [vmem:[#allocation70_spill] sm:$0xff]  ;;  %v4804_v48 = vld [vmem:[#allocation101_spill] sm:$0xff] }
 0x248   : > { %v4108_v49 = vsel %vm1739_vm5, %v1712_v54, %v1233_v7  ;;  %2503 = vmatpush.msra.mxu2 %v1838_v8  ;;  %2504 = vmatpush.msra.mxu3 %v1838_v8  ;;  %v1652_v42 = vsel %vm1640_vm2, %v1619_v33, %v4796_v57  ;;  %v1686_v9 = vsel %vm1673_vm3, %v1653_v18, %v4797_v45  ;;  %v2428_v56 = vld [vmem:[%s2746_s30 + $0x122] sm:$0xff]  ;;  %v4807_v45 = vld [vmem:[#allocation99_spill] sm:$0xff] }
 0x249   : > { %1963 = vmatpush.msra.mxu0 %v1838_v8  ;;  %v1685_v34 = vsel %vm1673_vm3, %v1652_v42, %v4798_v26  ;;  %v1719_v50 = vsel %vm1706_vm4, %v1686_v9, %v4799_v46  ;;  %v2396_v8 = vld [vmem:[%s2746_s30 + $0x121] sm:$0xff] }
 0x24a   : > { %v1718_v52 = vsel %vm1706_vm4, %v1685_v34, %v3750_v38  ;;  %v4800_v38 = vld [vmem:[#allocation80_spill] sm:$0xff]  ;;  %v4803_v59 = vld [vmem:[#allocation94_spill] sm:$0xff] }
 0x24c   : > { %1356 = vrot.lane.b32.xlu2 %v2379_v13, %s2664_s11  ;;  %1532 = vrot.lane.b32.xlu1 %v2435_v40, %s2663_s10  ;;  %v2419_v13 = vld [vmem:[%s2746_s30 + $0xb2] sm:$0xff] }
 0x24d   : > { %1516 = vrot.lane.b32.xlu0 %v2427_v32, %s2663_s10  ;;  %v2411_v40 = vld [vmem:[%s2746_s30 + $0x52] sm:$0xff] }
 0x24e   : > { %v4116_v6 = vpop.permute.xlu2 %1270  ;;  %v4118_v28 = vpop.permute.xlu1 %1240 }
 0x24f   : > { %v1239_v25 = vpop.permute.xlu0 %1238 }
 0x254   : > { %1278 = vrot.lane.b32.xlu2 %v4795_v27, %s2662_s9  ;;  %1262 = vrot.lane.b32.xlu1 %v2364_v14, %s2662_s9  ;;  %v4805_v27 = vld [vmem:[#allocation45_spill] sm:$0xff] }
 0x255   : > { %1372 = vrot.lane.b32.xlu0 %v2387_v21, %s2664_s11  ;;  %v4801_v21 = vld [vmem:[#allocation7_spill] sm:$0xff] }
 0x256   : > { %v1511_v44 = vpop.permute.xlu2 %1510  ;;  %v1247_v12 = vpop.permute.xlu1 %1246  ;;  %v1583_v55 = vsel %vm1574_vm0, %v2575_v37, %v4801_v21  ;;  %v2373_v37 = vld [vmem:[%s2746_s30 + $0x188] sm:$0xff] }
 0x257   : > { %v4149_v1 = vsel %vm1739_vm5, %v1719_v50, %v1247_v12  ;;  %v1245_v54 = vpop.permute.xlu0 %1244  ;;  %v1616_v4 = vsel %vm1607_vm1, %v1583_v55, %v4802_v36  ;;  %v2365_v12 = vld [vmem:[%s2746_s30 + $0x128] sm:$0xff] }
 0x258   : > { %v4152_v7 = vsel %vm1739_vm5, %v1718_v52, %v1245_v54  ;;  %v1649_v33 = vsel %vm1640_vm2, %v1616_v4, %v4803_v59  ;;  %v2388_v52 = vld [vmem:[%s2746_s30 + $0xc1] sm:$0xff]  ;;  %v4808_v4 = vld [vmem:[#allocation19_spill] sm:$0xff] }
 0x259   : > { %v1682_v18 = vsel %vm1673_vm3, %v1649_v33, %v4804_v48  ;;  %v2576_v36 = vld [vmem:[%s2746_s30 + $0x68] sm:$0xff]  ;;  %v4809_v33 = vld [vmem:[#allocation51_spill] sm:$0xff] }
 0x25a   : > { %v1715_v57 = vsel %vm1706_vm4, %v1682_v18, %v4805_v27  ;;  %v2429_v18 = vld [vmem:[%s2746_s30 + $0x12a] sm:$0xff]  ;;  %v4810_v27 = vld [vmem:[#allocation93_spill] sm:$0xff] }
 0x25b   : > { %v1748_v42 = vsel %vm1739_vm5, %v1715_v57, %v1239_v25  ;;  %v2380_v25 = vld [vmem:[%s2746_s30 + $0x61] sm:$0xff]  ;;  %v4811_v57 = vld [vmem:[#allocation108_spill] sm:$0xff] }
 0x25c   : > { %1390 = vrot.lane.b32.xlu2 %v2396_v8, %s2664_s11  ;;  %1500 = vrot.lane.b32.xlu1 %v2419_v13, %s2663_s10  ;;  %v1756_v13 = vsel %vm1739_vm5, %v3823_v20, %v4097_v63  ;;  %v1764_v20 = vsel %vm1739_vm5, %v3783_v29, %v4116_v6  ;;  %v2397_v6 = vld [vmem:[%s2746_s30 + $0x129] sm:$0xff] }
 0x25d   : > { %1484 = vrot.lane.b32.xlu0 %v2411_v40, %s2663_s10 }
 0x25e   : > { %v1367_v32 = vpop.permute.xlu2 %1366  ;;  %v1253_v14 = vpop.permute.xlu1 %1252 }
 0x25f   : > { %v4162_v2 = vsel %vm1739_vm5, %v4800_v38, %v1253_v14  ;;  %v1251_v62 = vpop.permute.xlu0 %1250  ;;  %v1781_v9 = vsel %vm1772_vm6, %v1748_v42, %v1367_v32  ;;  %v2420_v38 = vld [vmem:[%s2746_s30 + $0xc2] sm:$0xff]  ;;  %v4812_v42 = vld [vmem:[#allocation12_spill] sm:$0xff] }
 0x260   : > { %v4169_v0 = vsel %vm1739_vm5, %v3786_v17, %v1251_v62  ;;  %v4806_v17 = vld [vmem:[#allocation28_spill] sm:$0xff]  ;;  %v2412_v62 = vld [vmem:[%s2746_s30 + $0x62] sm:$0xff] }
 0x264   : > { %1534 = vrot.lane.b32.xlu2 %v4806_v17, %s2663_s10  ;;  %1518 = vrot.lane.b32.xlu1 %v2428_v56, %s2663_s10  ;;  %v1584_v56 = vsel %vm1574_vm0, %v2576_v36, %v4808_v4 }
 0x265   : > { %1406 = vrot.lane.b32.xlu0 %v4807_v45, %s2664_s11  ;;  %v1617_v48 = vsel %vm1607_vm1, %v1584_v56, %v4809_v33  ;;  %v2398_v33 = vld [vmem:[%s2746_s30 + $0x139] sm:$0xff] }
 0x266   : > { %v1495_v26 = vpop.permute.xlu2 %1494  ;;  %v4187_v34 = vpop.permute.xlu1 %1258  ;;  %v1650_v29 = vsel %vm1640_vm2, %v1617_v48, %v4810_v27  ;;  %v2421_v48 = vld [vmem:[%s2746_s30 + $0xca] sm:$0xff] }
 0x267   : > { %v1257_v46 = vpop.permute.xlu0 %1256  ;;  %v1814_v50 = vsel %vm1805_vm7, %v1781_v9, %v1495_v26  ;;  %v1683_v17 = vsel %vm1673_vm3, %v1650_v29, %v4811_v57  ;;  %v4813_v9 = vld [vmem:[#allocation98_spill] sm:$0xff]  ;;  %v2382_v57 = vld [vmem:[%s2746_s30 + $0x79] sm:$0xff] }
 0x268   : > { %2448 = vmatmul.msk.f32.vlgmr.msra.gmra.mxu1 %vm1851_vm8, %v1814_v50  ;;  %v1716_v45 = vsel %vm1706_vm4, %v1683_v17, %v4812_v42  ;;  %v2438_v17 = vld [vmem:[%s2746_s30 + $0x19a] sm:$0xff] }
 0x269   : > { %v1749_v26 = vsel %vm1739_vm5, %v1716_v45, %v4118_v28  ;;  %v2389_v28 = vld [vmem:[%s2746_s30 + $0xc9] sm:$0xff]  ;;  %v2430_v42 = vld [vmem:[%s2746_s30 + $0x13a] sm:$0xff] }
 0x26c   : > { %1264 = vrot.lane.b32.xlu2 %v2365_v12, %s2662_s9  ;;  %1374 = vrot.lane.b32.xlu1 %v2388_v52, %s2664_s11 }
 0x26d   : > { %1358 = vrot.lane.b32.xlu0 %v2380_v25, %s2664_s11 }
 0x26e   : > { %v1513_v54 = vpop.permute.xlu2 %1512  ;;  %v1399_v8 = vpop.permute.xlu1 %1398 }
 0x26f   : > { %v1383_v40 = vpop.permute.xlu0 %1382 }
 0x270   : > { %v1789_v32 = vsel %vm1772_vm6, %v1756_v13, %v1383_v40 }
 0x271   : > { %v1822_v14 = vsel %vm1805_vm7, %v1789_v32, %v1511_v44  ;;  %v1797_v44 = vsel %vm1772_vm6, %v1764_v20, %v1399_v8  ;;  %v2381_v32 = vld [vmem:[%s2746_s30 + $0x69] sm:$0xff] }
 0x272   : > { %2456 = vmatmul.msk.f32.vlgmr.msra.gmra.mxu2 %vm1851_vm8, %v1822_v14 }
 0x274   : > { %1502 = vrot.lane.b32.xlu2 %v2420_v38, %s2663_s10  ;;  %1486 = vrot.lane.b32.xlu1 %v2412_v62, %s2663_s10  ;;  %v1757_v62 = vsel %vm1739_vm5, %v3820_v41, %v1257_v46 }
 0x275   : > { %1280 = vrot.lane.b32.xlu0 %v2373_v37, %s2662_s9 }
 0x276   : > { %v1369_v63 = vpop.permute.xlu2 %1368  ;;  %v1351_v21 = vpop.permute.xlu1 %1350 }
 0x277   : > { %v1527_v55 = vpop.permute.xlu0 %1526  ;;  %v1782_v50 = vsel %vm1772_vm6, %v1749_v26, %v1369_v63  ;;  %v1773_v12 = vsel %vm1772_vm6, %v4023_v35, %v1351_v21  ;;  %v4814_v35 = vld [vmem:[#allocation23_spill] sm:$0xff] }
 0x278   : > { %v1830_v59 = vsel %vm1805_vm7, %v1797_v44, %v1527_v55  ;;  %v2413_v21 = vld [vmem:[%s2746_s30 + $0x6a] sm:$0xff]  ;;  %v2374_v44 = vld [vmem:[%s2746_s30 + $0x198] sm:$0xff] }
 0x279   : > { %2464 = vmatmul.msk.f32.vlgmr.msra.gmra.mxu3 %vm1851_vm8, %v1830_v59  ;;  %v2366_v55 = vld [vmem:[%s2746_s30 + $0x138] sm:$0xff] }
 0x27a   : > { %v2406_v59 = vld [vmem:[%s2746_s30 + $0x199] sm:$0xff] }
 0x27c   : > { %1520 = vrot.lane.b32.xlu2 %v2429_v18, %s2663_s10  ;;  %1408 = vrot.lane.b32.xlu1 %v4813_v9, %s2664_s11  ;;  %v4815_v9 = vld [vmem:[#allocation43_spill] sm:$0xff] }
 0x27d   : > { %1392 = vrot.lane.b32.xlu0 %v2397_v6, %s2664_s11  ;;  %v1758_v26 = vsel %vm1739_vm5, %v4815_v9, %v4187_v34 }
 0x27e   : > { %v1497_v52 = vpop.permute.xlu2 %1496  ;;  %v1479_v25 = vpop.permute.xlu1 %1478 }
 0x27f   : > { %v1273_v8 = vpop.permute.xlu0 %1272  ;;  %v1806_v13 = vsel %vm1805_vm7, %v1773_v12, %v1479_v25  ;;  %v1815_v40 = vsel %vm1805_vm7, %v1782_v50, %v1497_v52  ;;  %v2375_v25 = vld [vmem:[%s2746_s30 + $0x1a0] sm:$0xff] }
 0x280   : > { %2440 = vmatmul.msk.f32.vlgmr.msra.gmra.mxu0 %vm1851_vm8, %v1806_v13  ;;  %2449 = vmatmul.msk.f32.gmra.mxu1 %vm1851_vm8, %v1815_v40  ;;  %v1765_v41 = vsel %vm1739_vm5, %v3945_v53, %v1273_v8  ;;  %v2367_v8 = vld [vmem:[%s2746_s30 + $0x140] sm:$0xff] }
 0x281   : > { %v2390_v13 = vld [vmem:[%s2746_s30 + $0xd9] sm:$0xff] }
 0x284   : > { %1376 = vrot.lane.b32.xlu2 %v2389_v28, %s2664_s11  ;;  %1360 = vrot.lane.b32.xlu1 %v2381_v32, %s2664_s11 }
 0x285   : > { %1536 = vrot.lane.b32.xlu0 %v4814_v35, %s2663_s10 }
 0x286   : > { %v1515_v14 = vpop.permute.xlu2 %1514  ;;  %v1401_v38 = vpop.permute.xlu1 %1400 }
 0x287   : > { %v1385_v37 = vpop.permute.xlu0 %1384 }
 0x288   : > { %v1790_v20 = vsel %vm1772_vm6, %v1757_v62, %v1385_v37  ;;  %v2399_v37 = vld [vmem:[%s2746_s30 + $0x141] sm:$0xff] }
 0x289   : > { %v1823_v63 = vsel %vm1805_vm7, %v1790_v20, %v1513_v54  ;;  %v1798_v54 = vsel %vm1772_vm6, %v1765_v41, %v1401_v38  ;;  %v2414_v20 = vld [vmem:[%s2746_s30 + $0x7a] sm:$0xff] }
 0x28a   : > { %2457 = vmatmul.msk.f32.gmra.mxu2 %vm1851_vm8, %v1823_v63  ;;  %v2407_v41 = vld [vmem:[%s2746_s30 + $0x1a1] sm:$0xff] }
 0x28c   : > { %1488 = vrot.lane.b32.xlu2 %v2413_v21, %s2663_s10  ;;  %1282 = vrot.lane.b32.xlu1 %v2374_v44, %s2662_s9  ;;  %v2431_v44 = vld [vmem:[%s2746_s30 + $0x142] sm:$0xff] }
 0x28d   : > { %1266 = vrot.lane.b32.xlu0 %v2366_v55, %s2662_s9  ;;  %v2439_v55 = vld [vmem:[%s2746_s30 + $0x1a2] sm:$0xff] }
 0x28e   : > { %v4260_v46 = vpop.permute.xlu2 %1370  ;;  %v1353_v36 = vpop.permute.xlu1 %1352 }
 0x28f   : > { %v1529_v4 = vpop.permute.xlu0 %1528  ;;  %v1774_v53 = vsel %vm1772_vm6, %v3903_v15, %v1353_v36 }
 0x290   : > { %v1831_v56 = vsel %vm1805_vm7, %v1798_v54, %v1529_v4  ;;  %v1783_v54 = vsel %vm1772_vm6, %v4020_v60, %v4260_v46 }
 0x291   : > { %2465 = vmatmul.msk.f32.gmra.mxu3 %vm1851_vm8, %v1831_v56 }
 0x294   : > { %1410 = vrot.lane.b32.xlu2 %v2406_v59, %s2664_s11  ;;  %1394 = vrot.lane.b32.xlu1 %v2398_v33, %s2664_s11  ;;  %v2391_v59 = vld [vmem:[%s2746_s30 + $0xe1] sm:$0xff] }
 0x295   : > { %1504 = vrot.lane.b32.xlu0 %v2421_v48, %s2663_s10  ;;  %v2415_v33 = vld [vmem:[%s2746_s30 + $0x82] sm:$0xff] }
 0x296   : > { %v1483_v18 = vpop.permute.xlu2 %1482  ;;  %v1481_v27 = vpop.permute.xlu1 %1480 }
 0x297   : > { %v1275_v29 = vpop.permute.xlu0 %1274  ;;  %v1807_v6 = vsel %vm1805_vm7, %v1774_v53, %v1481_v27  ;;  %v2383_v53 = vld [vmem:[%s2746_s30 + $0x81] sm:$0xff] }
 0x298   : > { %2441 = vmatmul.msk.f32.gmra.mxu0 %vm1851_vm8, %v1807_v6  ;;  %v1766_v34 = vsel %vm1739_vm5, %v3941_v31, %v1275_v29  ;;  %v2422_v31 = vld [vmem:[%s2746_s30 + $0xda] sm:$0xff] }
 0x29c   : > { %1362 = vrot.lane.b32.xlu2 %v2382_v57, %s2664_s11  ;;  %1538 = vrot.lane.b32.xlu1 %v2438_v17, %s2663_s10 }
 0x29d   : > { %1522 = vrot.lane.b32.xlu0 %v2430_v42, %s2663_s10 }
 0x29e   : > { %v1405_v15 = vpop.permute.xlu2 %1404  ;;  %v1403_v45 = vpop.permute.xlu1 %1402 }
 0x29f   : > { %v1387_v50 = vpop.permute.xlu0 %1386  ;;  %v1799_v32 = vsel %vm1772_vm6, %v1766_v34, %v1403_v45 }
 0x2a0   : > { %v1791_v12 = vsel %vm1772_vm6, %v1758_v26, %v1387_v50 }
 0x2a1   : > { %v1824_v52 = vsel %vm1805_vm7, %v1791_v12, %v1515_v14 }
 0x2a2   : > { %2458 = vmatmul.msk.f32.gmra.mxu2 %vm1851_vm8, %v1824_v52 }
 0x2a4   : > { %1284 = vrot.lane.b32.xlu2 %v2375_v25, %s2662_s9  ;;  %1268 = vrot.lane.b32.xlu1 %v2367_v8, %s2662_s9 }
 0x2a5   : > { %1378 = vrot.lane.b32.xlu0 %v2390_v13, %s2664_s11 }
 0x2a6   : > { %v1357_v40 = vpop.permute.xlu2 %1356  ;;  %v1355_v28 = vpop.permute.xlu1 %1354 }
 0x2a7   : > { %v1775_v35 = vsel %vm1772_vm6, %v4060_v39, %v1355_v28  ;;  %v1531_v14 = vpop.permute.xlu0 %1530  ;;  %v1776_v50 = vsel %vm1772_vm6, %v4053_v3, %v1357_v40 }
 0x2a8   : > { %v1832_v38 = vsel %vm1805_vm7, %v1799_v32, %v1531_v14  ;;  %v1808_v62 = vsel %vm1805_vm7, %v1775_v35, %v1483_v18 }
 0x2a9   : > { %2466 = vmatmul.msk.f32.gmra.mxu3 %vm1851_vm8, %v1832_v38  ;;  %2442 = vmatmul.msk.f32.gmra.mxu0 %vm1851_vm8, %v1808_v62 }
 0x2ac   : > { %1506 = vrot.lane.b32.xlu1 %v2422_v31, %s2663_s10  ;;  %1396 = vrot.lane.b32.xlu2 %v2399_v37, %s2664_s11  ;;  %v4365_v31 = vld [vmem:[%s4533_s2] ss:$0 sm:$0xff] }
 0x2ad   : > { %1490 = vrot.lane.b32.xlu0 %v2414_v20, %s2663_s10 }
 0x2ae   : > { %v1277_v39 = vpop.permute.xlu1 %1276  ;;  %v1279_v21 = vpop.permute.xlu2 %1278 }
 0x2af   : > { %v1261_v63 = vpop.permute.xlu0 %1260  ;;  %v1767_v18 = vsel %vm1739_vm5, %v3817_v23, %v1277_v39  ;;  %v2423_v23 = vld [vmem:[%s2746_s30 + $0xe2] sm:$0xff]  ;;  %v1768_v3 = vsel %vm1739_vm5, %v3990_v58, %v1279_v21  ;;  %s231_s30 = sand.u32 1, %s2639_s13  }
 0x2b0   : > { %v1759_v60 = vsel %vm1739_vm5, %v3866_v19, %v1261_v63  ;;  %v1800_v27 = vsel %vm1772_vm6, %v1767_v18, %v1405_v15  ;;  %s2246_s9 = sshll.u32 %s231_s30, 8  ;;  %s2094_s15 = scalar_lea.sflag [#allocation3], %s231_s30 }
 0x2b1   : > { %s4371_s28 = scalar_lea.vmem [#allocation2], %s2246_s9 }
 0x2b2   : > { %s2110_s8 = sshll.u32 %s4371_s28, 4  ;;  %s2111_s8 = int_to_ptr.vmem [resolvable:$true] %s2110_s8 }
 0x2b4   : > { %1524 = vrot.lane.b32.xlu1 %v2431_v44, %s2663_s10  ;;  %1540 = vrot.lane.b32.xlu2 %v2439_v55, %s2663_s10 }
 0x2b5   : > { %1412 = vrot.lane.b32.xlu0 %v2407_v41, %s2664_s11 }
 0x2b6   : > { %v1389_v36 = vpop.permute.xlu1 %1388  ;;  %v1391_v48 = vpop.permute.xlu2 %1390 }
 0x2b7   : > { %v1499_v4 = vpop.permute.xlu0 %1498  ;;  %v1792_v29 = vsel %vm1772_vm6, %v1759_v60, %v1389_v36 }
 0x2b8   : > { %v1816_v56 = vsel %vm1805_vm7, %v1783_v54, %v1499_v4 }
 0x2b9   : > { %2450 = vmatmul.msk.f32.gmra.mxu1 %vm1851_vm8, %v1816_v56 }
 0x2bc   : > { %1380 = vrot.lane.b32.xlu1 %v2391_v59, %s2664_s11  ;;  %1492 = vrot.lane.b32.xlu2 %v2415_v33, %s2663_s10 }
 0x2bd   : > { %1364 = vrot.lane.b32.xlu0 %v2383_v53, %s2664_s11 }
 0x2be   : > { %v1533_v46 = vpop.permute.xlu1 %1532  ;;  %v1535_v42 = vpop.permute.xlu2 %1534 }
 0x2bf   : > { %v1517_v6 = vpop.permute.xlu0 %1516  ;;  %v1833_v57 = vsel %vm1805_vm7, %v1800_v27, %v1533_v46 }
 0x2c0   : > { %v1825_v17 = vsel %vm1805_vm7, %v1792_v29, %v1517_v6  ;;  %2467 = vmatmul.msk.f32.gmra.mxu3 %vm1851_vm8, %v1833_v57 }
 0x2c1   : > { %2459 = vmatmul.msk.f32.gmra.mxu2 %vm1851_vm8, %v1825_v17 }
 0x2c5   : > { %1508 = vrot.lane.b32.xlu0 %v2423_v23, %s2663_s10 }
 0x2c6   : > { %v1263_v45 = vpop.permute.xlu1 %1262  ;;  %v1265_v9 = vpop.permute.xlu2 %1264 }
 0x2c7   : > { %v1373_v19 = vpop.permute.xlu0 %1372  ;;  %v1760_v8 = vsel %vm1739_vm5, %v3863_v16, %v1263_v45  ;;  %v1761_v41 = vsel %vm1739_vm5, %v3753_v11, %v1265_v9 }
 0x2c8   : > { %v1784_v15 = vsel %vm1772_vm6, %v4152_v7, %v1373_v19  ;;  %v1793_v7 = vsel %vm1772_vm6, %v1760_v8, %v1391_v48 }
 0x2ce   : > { %v1501_v26 = vpop.permute.xlu1 %1500  ;;  %v1503_v28 = vpop.permute.xlu2 %1502 }
 0x2cf   : > { %v1485_v12 = vpop.permute.xlu0 %1484  ;;  %v1817_v52 = vsel %vm1805_vm7, %v1784_v15, %v1501_v26 }
 0x2d0   : > { %v1809_v25 = vsel %vm1805_vm7, %v1776_v50, %v1485_v12  ;;  %2451 = vmatmul.msk.f32.gmra.mxu1 %vm1851_vm8, %v1817_v52 }
 0x2d1   : > { %2443 = vmatmul.msk.f32.gmra.mxu0 %vm1851_vm8, %v1809_v25 }
 0x2d6   : > { %v1519_v13 = vpop.permute.xlu1 %1518  ;;  %v1521_v62 = vpop.permute.xlu2 %1520 }
 0x2d7   : > { %v1407_v34 = vpop.permute.xlu0 %1406  ;;  %v1826_v40 = vsel %vm1805_vm7, %v1793_v7, %v1519_v13 }
 0x2d8   : > { %v1801_v32 = vsel %vm1772_vm6, %v1768_v3, %v1407_v34  ;;  %2460 = vmatmul.msk.f32.gmra.mxu2 %vm1851_vm8, %v1826_v40 }
 0x2d9   : > { %v1834_v35 = vsel %vm1805_vm7, %v1801_v32, %v1535_v42 }
 0x2da   : > { %2468 = vmatmul.msk.f32.gmra.mxu3 %vm1851_vm8, %v1834_v35 }
 0x2de   : > { %v1375_v16 = vpop.permute.xlu1 %1374  ;;  %v1377_v44 = vpop.permute.xlu2 %1376 }
 0x2df   : > { %v1785_v14 = vsel %vm1772_vm6, %v4149_v1, %v1375_v16  ;;  %v1359_v38 = vpop.permute.xlu0 %1358  ;;  %v1786_v19 = vsel %vm1772_vm6, %v4049_v24, %v1377_v44 }
 0x2e0   : > { %v1818_v58 = vsel %vm1805_vm7, %v1785_v14, %v1503_v28  ;;  %v1777_v20 = vsel %vm1772_vm6, %v3938_v10, %v1359_v38 }
 0x2e1   : > { %2452 = vmatmul.msk.f32.gmra.mxu1 %vm1851_vm8, %v1818_v58 }
 0x2e5   : > { %v1989_v37 = vpop.f32.mrf.mxu1 }
 0x2e6   : > { %v1990_v1 = vadd.f32 %v4365_v31, %v1989_v37  ;;  %v1487_v39 = vpop.permute.xlu1 %1486  ;;  %v1489_v56 = vpop.permute.xlu2 %1488 }
 0x2e7   : > { %v1281_v63 = vpop.permute.xlu0 %1280  ;;  %v1810_v21 = vsel %vm1805_vm7, %v1777_v20, %v1487_v39 }
 0x2e8   : > { %2069 = vst [vmem:[%s4371_s28 + $0x40] sm:$0xff] %v1990_v1  ;;  %2444 = vmatmul.msk.f32.gmra.mxu0 %vm1851_vm8, %v1810_v21  ;;  %v1769_v59 = vsel %vm1739_vm5, %v3987_v5, %v1281_v63 }
 0x2ee   : > { %v1409_v55 = vpop.permute.xlu1 %1408  ;;  %v1411_v42 = vpop.permute.xlu2 %1410 }
 0x2ef   : > { %v1393_v36 = vpop.permute.xlu0 %1392  ;;  %v1802_v53 = vsel %vm1772_vm6, %v1769_v59, %v1409_v55 }
 0x2f0   : > { %v1794_v10 = vsel %vm1772_vm6, %v1761_v41, %v1393_v36 }
 0x2f1   : > { %v1827_v54 = vsel %vm1805_vm7, %v1794_v10, %v1521_v62 }
 0x2f2   : > { %2461 = vmatmul.msk.f32.gmra.mxu2 %vm1851_vm8, %v1827_v54 }
 0x2f5   : > { %v2013_v4 = vpop.f32.mrf.mxu2 }
 0x2f6   : > { %v2014_v33 = vadd.f32 %v4365_v31, %v2013_v4  ;;  %v1361_v48 = vpop.permute.xlu1 %1360  ;;  %v1363_v26 = vpop.permute.xlu2 %1362 }
 0x2f7   : > { %v1778_v11 = vsel %vm1772_vm6, %v4108_v49, %v1361_v48  ;;  %v1537_v18 = vpop.permute.xlu0 %1536  ;;  %v1779_v62 = vsel %vm1772_vm6, %v4102_v30, %v1363_v26 }
 0x2f8   : > { %2077 = vst [vmem:[%s4371_s28 + $0x80] sm:$0xff] %v2014_v33  ;;  %v1835_v60 = vsel %vm1805_vm7, %v1802_v53, %v1537_v18  ;;  %v1811_v46 = vsel %vm1805_vm7, %v1778_v11, %v1489_v56 }
 0x2f9   : > { %2469 = vmatmul.msk.f32.gmra.mxu3 %vm1851_vm8, %v1835_v60  ;;  %2445 = vmatmul.msk.f32.gmra.mxu0 %vm1851_vm8, %v1811_v46 }
 0x2fc   : > { %v2037_v5 = vpop.f32.mrf.mxu3 }
 0x2fd   : > { %v2038_v27 = vadd.f32 %v4365_v31, %v2037_v5  ;;  %v1965_v29 = vpop.f32.mrf.mxu0  ;;  %v1992_v6 = vpop.f32.mrf.mxu1 }
 0x2fe   : > { %v1966_v57 = vadd.f32 %v4365_v31, %v1965_v29  ;;  %v1993_v49 = vadd.f32 %v4365_v31, %v1992_v6  ;;  %v1283_v17 = vpop.permute.xlu1 %1282 }
 0x2ff   : > { %2085 = vst [vmem:[%s4371_s28 + $0xc0] sm:$0xff] %v2038_v27  ;;  %v1267_v23 = vpop.permute.xlu0 %1266  ;;  %v1770_v50 = vsel %vm1739_vm5, %v3860_v43, %v1283_v17  ;;  %v1285_v43 = vpop.permute.xlu2 %1284 }
 0x300   : > { %2061 = vst [vmem:[%s4371_s28] sm:$0xff] %v1966_v57  ;;  %v1762_v52 = vsel %vm1739_vm5, %v3909_v22, %v1267_v23  ;;  %v1803_v13 = vsel %vm1772_vm6, %v1770_v50, %v1411_v42  ;;  %v1771_v41 = vsel %vm1739_vm5, %v4030_v61, %v1285_v43 }
 0x301   : > { %2070 = vst [vmem:[%s4371_s28 + $0x48] sm:$0xff] %v1993_v49 }
 0x306   : > { %v1395_v45 = vpop.permute.xlu1 %1394 }
 0x307   : > { %v1505_v9 = vpop.permute.xlu0 %1504  ;;  %v1795_v24 = vsel %vm1772_vm6, %v1762_v52, %v1395_v45  ;;  %v1397_v14 = vpop.permute.xlu2 %1396 }
 0x308   : > { %v1819_v15 = vsel %vm1805_vm7, %v1786_v19, %v1505_v9 }
 0x309   : > { %2453 = vmatmul.msk.f32.gmra.mxu1 %vm1851_vm8, %v1819_v15 }
 0x30d   : > { %v2016_v12 = vpop.f32.mrf.mxu2 }
 0x30e   : > { %v2017_v25 = vadd.f32 %v4365_v31, %v2016_v12  ;;  %v1539_v8 = vpop.permute.xlu1 %1538 }
 0x30f   : > { %v1523_v7 = vpop.permute.xlu0 %1522  ;;  %v1836_v3 = vsel %vm1805_vm7, %v1803_v13, %v1539_v8  ;;  %v1541_v63 = vpop.permute.xlu2 %1540 }
 0x310   : > { %2078 = vst [vmem:[%s4371_s28 + $0x88] sm:$0xff] %v2017_v25  ;;  %v1828_v34 = vsel %vm1805_vm7, %v1795_v24, %v1523_v7  ;;  %2470 = vmatmul.msk.f32.gmra.mxu3 %vm1851_vm8, %v1836_v3 }
 0x311   : > { %2462 = vmatmul.msk.f32.gmra.mxu2 %vm1851_vm8, %v1828_v34 }
 0x314   : > { %v2040_v22 = vpop.f32.mrf.mxu3 }
 0x315   : > { %v2041_v40 = vadd.f32 %v4365_v31, %v2040_v22  ;;  %v1968_v28 = vpop.f32.mrf.mxu0 }
 0x316   : > { %v1969_v32 = vadd.f32 %v4365_v31, %v1968_v28  ;;  %v1269_v35 = vpop.permute.xlu1 %1268 }
 0x317   : > { %2086 = vst [vmem:[%s4371_s28 + $0xc8] sm:$0xff] %v2041_v40  ;;  %v1379_v16 = vpop.permute.xlu0 %1378  ;;  %v1763_v39 = vsel %vm1739_vm5, %v3906_v47, %v1269_v35  ;;  %v1493_v61 = vpop.permute.xlu2 %1492 }
 0x318   : > { %2062 = vst [vmem:[%s4371_s28 + $0x8] sm:$0xff] %v1969_v32  ;;  %v1787_v38 = vsel %vm1772_vm6, %v4169_v0, %v1379_v16  ;;  %v1796_v21 = vsel %vm1772_vm6, %v1763_v39, %v1397_v14 }
 0x31e   : > { %v1507_v58 = vpop.permute.xlu1 %1506 }
 0x31f   : > { %v1491_v37 = vpop.permute.xlu0 %1490  ;;  %v1820_v20 = vsel %vm1805_vm7, %v1787_v38, %v1507_v58 }
 0x320   : > { %v1812_v1 = vsel %vm1805_vm7, %v1779_v62, %v1491_v37  ;;  %2454 = vmatmul.msk.f32.gmra.mxu1 %vm1851_vm8, %v1820_v20 }
 0x321   : > { %2446 = vmatmul.msk.f32.gmra.mxu0 %vm1851_vm8, %v1812_v1 }
 0x325   : > { %v2019_v0 = vpop.f32.mrf.mxu2 }
 0x326   : > { %v2020_v30 = vadd.f32 %v4365_v31, %v2019_v0  ;;  %v1525_v44 = vpop.permute.xlu1 %1524  ;;  %v1971_v55 = vpop.f32.mrf.mxu0 }
 0x327   : > { %v1413_v36 = vpop.permute.xlu0 %1412  ;;  %v1972_v10 = vadd.f32 %v4365_v31, %v1971_v55  ;;  %v1829_v54 = vsel %vm1805_vm7, %v1796_v21, %v1525_v44 }
 0x328   : > { %2079 = vst [vmem:[%s4371_s28 + $0x90] sm:$0xff] %v2020_v30  ;;  %v1804_v47 = vsel %vm1772_vm6, %v1771_v41, %v1413_v36  ;;  %2463 = vmatmul.msk.f32.gmra.mxu2 %vm1851_vm8, %v1829_v54 }
 0x329   : > { %2063 = vst [vmem:[%s4371_s28 + $0x10] sm:$0xff] %v1972_v10  ;;  %v1837_v4 = vsel %vm1805_vm7, %v1804_v47, %v1541_v63 }
 0x32a   : > { %2471 = vmatmul.msk.f32.gmra.mxu3 %vm1851_vm8, %v1837_v4 }
 0x32c   : > { %v2043_v56 = vpop.f32.mrf.mxu3 }
 0x32d   : > { %v2044_v59 = vadd.f32 %v4365_v31, %v2043_v56 }
 0x32e   : > { %v1381_v11 = vpop.permute.xlu1 %1380 }
 0x32f   : > { %2087 = vst [vmem:[%s4371_s28 + $0xd0] sm:$0xff] %v2044_v59  ;;  %v1365_v33 = vpop.permute.xlu0 %1364  ;;  %v1788_v60 = vsel %vm1772_vm6, %v4162_v2, %v1381_v11 }
 0x330   : > { %v1780_v48 = vsel %vm1772_vm6, %v3984_v51, %v1365_v33 }
 0x331   : > { %v1813_v53 = vsel %vm1805_vm7, %v1780_v48, %v1493_v61 }
 0x332   : > { %2447 = vmatmul.msk.f32.gmra.mxu0 %vm1851_vm8, %v1813_v53 }
 0x336   : > { %v1995_v18 = vpop.f32.mrf.mxu1 }
 0x337   : > { %v1996_v46 = vadd.f32 %v4365_v31, %v1995_v18  ;;  %v1509_v5 = vpop.permute.xlu0 %1508 }
 0x338   : > { %v1821_v27 = vsel %vm1805_vm7, %v1788_v60, %v1509_v5 }
 0x339   : > { %2071 = vst [vmem:[%s4371_s28 + $0x50] sm:$0xff] %v1996_v46  ;;  %2455 = vmatmul.msk.f32.gmra.mxu1 %vm1851_vm8, %v1821_v27 }
 0x343   : > { %v2046_v51 = vpop.f32.mrf.mxu3 }
 0x344   : > { %v2022_v29 = vpop.f32.mrf.mxu2  ;;  %v2047_v6 = vadd.f32 %v4365_v31, %v2046_v51 }
 0x345   : > { %v2023_v57 = vadd.f32 %v4365_v31, %v2022_v29 }
 0x346   : > { %2088 = vst [vmem:[%s4371_s28 + $0xd8] sm:$0xff] %v2047_v6 }
 0x347   : > { %2080 = vst [vmem:[%s4371_s28 + $0x98] sm:$0xff] %v2023_v57 }
 0x34d   : > { %v1998_v2 = vpop.f32.mrf.mxu1 }
 0x34e   : > { %v1974_v49 = vpop.f32.mrf.mxu0  ;;  %v1999_v17 = vadd.f32 %v4365_v31, %v1998_v2 }
 0x34f   : > { %v1975_v23 = vadd.f32 %v4365_v31, %v1974_v49 }
 0x350   : > { %2072 = vst [vmem:[%s4371_s28 + $0x58] sm:$0xff] %v1999_v17 }
 0x351   : > { %2064 = vst [vmem:[%s4371_s28 + $0x18] sm:$0xff] %v1975_v23 }
 0x35b   : > { %v2025_v42 = vpop.f32.mrf.mxu2 }
 0x35c   : > { %v2026_v45 = vadd.f32 %v4365_v31, %v2025_v42 }
 0x35d   : > { %v2049_v19 = vpop.f32.mrf.mxu3 }
 0x35e   : > { %2081 = vst [vmem:[%s4371_s28 + $0xa0] sm:$0xff] %v2026_v45  ;;  %v2050_v9 = vadd.f32 %v4365_v31, %v2049_v19  ;;  %v2001_v15 = vpop.f32.mrf.mxu1 }
 0x35f   : > { %v2002_v26 = vadd.f32 %v4365_v31, %v2001_v15 }
 0x360   : > { %2089 = vst [vmem:[%s4371_s28 + $0xe0] sm:$0xff] %v2050_v9 }
 0x361   : > { %2073 = vst [vmem:[%s4371_s28 + $0x60] sm:$0xff] %v2002_v26 }
 0x365   : > { %v1977_v50 = vpop.f32.mrf.mxu0 }
 0x366   : > { %v1978_v12 = vadd.f32 %v4365_v31, %v1977_v50 }
 0x368   : > { %2065 = vst [vmem:[%s4371_s28 + $0x20] sm:$0xff] %v1978_v12 }
 0x375   : > { %v2028_v52 = vpop.f32.mrf.mxu2 }
 0x376   : > { %v2029_v25 = vadd.f32 %v4365_v31, %v2028_v52  ;;  %v1980_v8 = vpop.f32.mrf.mxu0 }
 0x377   : > { %v1981_v13 = vadd.f32 %v4365_v31, %v1980_v8 }
 0x378   : > { %2082 = vst [vmem:[%s4371_s28 + $0xa8] sm:$0xff] %v2029_v25 }
 0x379   : > { %2066 = vst [vmem:[%s4371_s28 + $0x28] sm:$0xff] %v1981_v13 }
 0x37c   : > { %v2052_v24 = vpop.f32.mrf.mxu3 }
 0x37d   : > { %v2053_v7 = vadd.f32 %v4365_v31, %v2052_v24 }
 0x37f   : > { %2090 = vst [vmem:[%s4371_s28 + $0xe8] sm:$0xff] %v2053_v7 }
 0x386   : > { %v2004_v3 = vpop.f32.mrf.mxu1 }
 0x387   : > { %v2005_v34 = vadd.f32 %v4365_v31, %v2004_v3 }
 0x389   : > { %2074 = vst [vmem:[%s4371_s28 + $0x68] sm:$0xff] %v2005_v34 }
 0x393   : > { %v2055_v43 = vpop.f32.mrf.mxu3 }
 0x394   : > { %v2031_v22 = vpop.f32.mrf.mxu2  ;;  %v2056_v40 = vadd.f32 %v4365_v31, %v2055_v43 }
 0x395   : > { %v2032_v28 = vadd.f32 %v4365_v31, %v2031_v22 }
 0x396   : > { %2091 = vst [vmem:[%s4371_s28 + $0xf0] sm:$0xff] %v2056_v40 }
 0x397   : > { %2083 = vst [vmem:[%s4371_s28 + $0xb0] sm:$0xff] %v2032_v28 }
 0x39d   : > { %v2007_v32 = vpop.f32.mrf.mxu1 }
 0x39e   : > { %v1983_v35 = vpop.f32.mrf.mxu0  ;;  %v2008_v16 = vadd.f32 %v4365_v31, %v2007_v32 }
 0x39f   : > { %v1984_v14 = vadd.f32 %v4365_v31, %v1983_v35 }
 0x3a0   : > { %2075 = vst [vmem:[%s4371_s28 + $0x70] sm:$0xff] %v2008_v16 }
 0x3a1   : > { %2067 = vst [vmem:[%s4371_s28 + $0x30] sm:$0xff] %v1984_v14 }
 0x3ab   : > { %v2034_v38 = vpop.f32.mrf.mxu2 }
 0x3ac   : > { %v2035_v58 = vadd.f32 %v4365_v31, %v2034_v38 }
 0x3ad   : > { %v2058_v62 = vpop.f32.mrf.mxu3 }
 0x3ae   : > { %2084 = vst [vmem:[%s4371_s28 + $0xb8] sm:$0xff] %v2035_v58  ;;  %v2059_v37 = vadd.f32 %v4365_v31, %v2058_v62 }
 0x3af   : > { %v1986_v20 = vpop.f32.mrf.mxu0 }
 0x3b0   : > { %2092 = vst [vmem:[%s4371_s28 + $0xf8] sm:$0xff] %v2059_v37  ;;  %v1987_v1 = vadd.f32 %v4365_v31, %v1986_v20 }
 0x3b2   : > { %2068 = vst [vmem:[%s4371_s28 + $0x38] sm:$0xff] %v1987_v1 }
 0x3b6   : > { %v2010_v39 = vpop.f32.mrf.mxu1 }
 0x3b7   : > { %v2011_v63 = vadd.f32 %v4365_v31, %v2010_v39 }
 0x3b9   : > { %2076 = vst [vmem:[%s4371_s28 + $0x78] sm:$0xff] %v2011_v63 }
 0x3ba   : > { %2604 = shalt.err (!%p2601_p5)
}
 0x3bb   : > { %s2665_s30 = smov 128  }
 0x3bc   : > { %2506 = dma.vmem_to_hbm [thread:$0]  (%p2726_p4), %s2111_s8, 4096, %s2113_s18, %s2094_s15, %s2665_s30, %s2665_s30, %s2657_s4  }
 0x3bd PF: > { %p2512_p6 = scmp.ge.s32.totalorder %s2655_s17, 2  ;;  %s2127_s11 = sand.u32 1, %s2635_s12  }
 0x3be   : > { %s2128_s28 = scalar_lea.sflag [#allocation3], %s2127_s11 }
 0x3bf   : > { %p2509_p7 = pnand %p2512_p6, %p2733_p8 }
 0x3c1   : > { %p2510_p9 = pneg %p2509_p7 }
 0x3c3   : > { %2630 = dma.done.wait (%p2510_p9), %s2128_s28, 4096  }
 0x3c4   : > { %2632 = vsyncadd (%p2510_p9), %s2128_s28, 4294963200  ;;  %s16_s17 = sadd.s32 1, %s2655_s17   ;;  %s4816_s12 = smov %s2639_s13 }
 0x3c5   : > { %p13_p10 = scmp.ge.s32.totalorder %s16_s17, 4   ;;  %s4817_s13 = smov %s2643_s14 }
 0x3c6   : > { %s4818_s14 = smov %s2739_s25  ;;  %s4819_s15 = smov %s2651_s16 }
 0x3c7   : > { %s4820_s16 = smov %s4822_s20  ;;  %15 = sbr.rel (!%p13_p10) target bundleno = 4 (0x4), region = 76 }
 0x3cc   :  { %2134 = vsyncpa [#allocation3], 1 }
 0x3cd   :  { %2136 = vsyncpa [#allocation3 + $0x1], 1 }

</bundles_post_ra>
